<compile_context>
chip_gen: v6e
topology: v6e:2x2x1
jax: 0.10.0
libtpu: 0.0.40
codegen_flags: <defaults>
</compile_context>

<pallas_src>
import functools

import jax
import jax.numpy as jnp
from jax.experimental import pallas as pl
from jax.experimental.pallas import tpu as pltpu

LN_EPS = 1e-5
NEG_BIG = -1e30  # stands in for -inf in the key-padding additive bias (kept in fp32)


def _layer_norm(v, g_ref, b_ref):
    """fp32 LayerNorm over the last dim, affine params are (1, D) refs."""
    v32 = v.astype(jnp.float32)
    mu = jnp.mean(v32, axis=-1, keepdims=True)
    var = jnp.mean(jnp.square(v32 - mu), axis=-1, keepdims=True)
    vn = (v32 - mu) * jax.lax.rsqrt(var + LN_EPS)
    return vn * g_ref[...] + b_ref[...]


def resblock_kernel(
    x_ref,        # (1, L, D)  current batch element (fp32)
    maskb_ref,    # (1, 1, L)  additive key-padding bias (0 or NEG_BIG), fp32
    ln1g_ref, ln1b_ref,      # (1, D) fp32
    wqkv_ref, bqkv_ref,      # (D, 3D) bf16, (1, 3D) fp32   (Wq pre-scaled by 1/sqrt(Dh))
    wo_ref, bo_ref,          # (D, D)  bf16, (1, D)  fp32
    ln2g_ref, ln2b_ref,      # (1, D) fp32
    wfc_ref, bfc_ref,        # (D, 4D) bf16, (1, 4D) fp32
    wpr_ref, bpr_ref,        # (4D, D) bf16, (1, D)  fp32
    out_ref,                 # (1, L, D)
    *, num_heads,
):
    x = x_ref[0]                  # (L, D) fp32
    maskb = maskb_ref[0]          # (1, L) fp32

    L, D = x.shape
    head_dim = D // num_heads

    # ---- pre-LN multi-head self-attention ----
    h1 = _layer_norm(x, ln1g_ref, ln1b_ref)            # (L, D) fp32
    h1_bf = h1.astype(jnp.bfloat16)

    # fused QKV projection: one full-width MXU matmul, fp32 accumulate
    qkv = jnp.dot(h1_bf, wqkv_ref[...],
                  preferred_element_type=jnp.float32) + bqkv_ref[...]   # (L, 3D) fp32

    # TODO(synk): for large head counts switch this static unroll to a
    # lax.fori_loop over an (H, L, Dh) scratch to bound vreg live ranges.
    head_outs = []
    for h in range(num_heads):
        lo = h * head_dim
        qh = qkv[:, lo:lo + head_dim].astype(jnp.bfloat16)                    # (L, Dh)
        kh = qkv[:, D + lo:D + lo + head_dim].astype(jnp.bfloat16)            # (L, Dh)
        vh = qkv[:, 2 * D + lo:2 * D + lo + head_dim].astype(jnp.bfloat16)    # (L, Dh)

        # scores = q @ k^T  (scale already folded into Wq/bq) -> (L, L) fp32
        s = jax.lax.dot_general(qh, kh, (((1,), (1,)), ((), ())),
                                preferred_element_type=jnp.float32)
        s = s + maskb                         # key padding mask, broadcast over queries
        s = s - jnp.max(s, axis=-1, keepdims=True)
        p = jnp.exp(s)                        # unnormalized, fp32
        row_sum = jnp.sum(p, axis=-1, keepdims=True)          # (L, 1) fp32

        oh = jnp.dot(p.astype(jnp.bfloat16), vh,
                     preferred_element_type=jnp.float32)       # (L, Dh) fp32
        # normalize after PV: O(L*Dh) mul with EUP reciprocal instead of (L,L) divide
        oh = oh * pl.reciprocal(row_sum, approx=True)
        head_outs.append(oh)

    attn = jnp.concatenate(head_outs, axis=-1)                 # (L, D) fp32
    attn_out = jnp.dot(attn.astype(jnp.bfloat16), wo_ref[...],
                       preferred_element_type=jnp.float32) + bo_ref[...]

    x1 = x + attn_out.astype(x.dtype)

    # ---- pre-LN MLP with QuickGELU ----
    h2 = _layer_norm(x1, ln2g_ref, ln2b_ref)
    fc = jnp.dot(h2.astype(jnp.bfloat16), wfc_ref[...],
                 preferred_element_type=jnp.float32) + bfc_ref[...]          # (L, 4D)
    gelu = fc * jax.nn.sigmoid(1.702 * fc)
    mlp = jnp.dot(gelu.astype(jnp.bfloat16), wpr_ref[...],
                  preferred_element_type=jnp.float32) + bpr_ref[...]         # (L, D)

    out_ref[0] = x1 + mlp.astype(x.dtype)


def residual_attention_block(x_bld, mask_bias, params, num_heads):
    """One ResidualAttentionBlock.  x_bld: (B, L, D), mask_bias: (B, 1, L)."""
    B, L, D = x_bld.shape
    (ln1g, ln1b, wqkv, bqkv, wo, bo, ln2g, ln2b, wfc, bfc, wpr, bpr) = params

    # weights / params use constant index maps -> resident across the batch grid
    const2 = lambda arr: pl.BlockSpec(arr.shape, lambda b: (0, 0))

    kernel = functools.partial(resblock_kernel, num_heads=num_heads)

    return pl.pallas_call(
        kernel,
        out_shape=jax.ShapeDtypeStruct((B, L, D), x_bld.dtype),
        grid_spec=pltpu.PrefetchScalarGridSpec(
            num_scalar_prefetch=0,
            grid=(B,),
            in_specs=[
                pl.BlockSpec((1, L, D), lambda b: (b, 0, 0)),   # x
                pl.BlockSpec((1, 1, L), lambda b: (b, 0, 0)),   # mask bias
                const2(ln1g), const2(ln1b),                     # ln1 gamma/beta
                const2(wqkv), const2(bqkv),                     # fused QKV
                const2(wo), const2(bo),                         # out proj
                const2(ln2g), const2(ln2b),                     # ln2 gamma/beta
                const2(wfc), const2(bfc),                       # c_fc
                const2(wpr), const2(bpr),                       # c_proj
            ],
            out_specs=pl.BlockSpec((1, L, D), lambda b: (b, 0, 0)),
        ),
        compiler_params=pltpu.CompilerParams(
            dimension_semantics=("parallel",),
            vmem_limit_bytes=64 * 1024 * 1024,
        ),
    )(x_bld, mask_bias, ln1g, ln1b, wqkv, bqkv, wo, bo,
      ln2g, ln2b, wfc, bfc, wpr, bpr)


def make_block_params(key, D, H):
    """Deterministic synthetic params in PyTorch layout, repacked for the kernel.

    Kernel layout: fused bf16 QKV weight (D,3D) with 1/sqrt(Dh) folded into the
    Q columns, lane-dense fp32 biases, bf16 matmul weights, fp32 LN params.
    """
    Dh = D // H
    scale = 1.0 / (Dh ** 0.5)
    ks = jax.random.split(key, 8)
    in_proj_w = jax.random.normal(ks[0], (3 * D, D), jnp.float32) * 0.02
    in_proj_b = jax.random.normal(ks[1], (3 * D,), jnp.float32) * 0.02
    out_proj_w = jax.random.normal(ks[2], (D, D), jnp.float32) * 0.02
    out_proj_b = jax.random.normal(ks[3], (D,), jnp.float32) * 0.02
    fc_w = jax.random.normal(ks[4], (4 * D, D), jnp.float32) * 0.02
    fc_b = jax.random.normal(ks[5], (4 * D,), jnp.float32) * 0.02
    proj_w = jax.random.normal(ks[6], (D, 4 * D), jnp.float32) * 0.02
    proj_b = jax.random.normal(ks[7], (D,), jnp.float32) * 0.02
    ln1g = jnp.ones((1, D), jnp.float32); ln1b = jnp.zeros((1, D), jnp.float32)
    ln2g = jnp.ones((1, D), jnp.float32); ln2b = jnp.zeros((1, D), jnp.float32)

    # torch computes x @ W.T + b; convert to x @ W form and fuse Q|K|V columns,
    # folding the softmax scale into the Q projection (weight and bias).
    Wq, Wk, Wv = in_proj_w[:D], in_proj_w[D:2 * D], in_proj_w[2 * D:]
    bq, bk, bv = in_proj_b[:D], in_proj_b[D:2 * D], in_proj_b[2 * D:]
    wqkv = jnp.concatenate([Wq.T * scale, Wk.T, Wv.T], axis=1)      # (D, 3D)
    bqkv = jnp.concatenate([bq * scale, bk, bv]).reshape(1, 3 * D)  # (1, 3D)

    wo = out_proj_w.T                                                # (D, D)
    bo = out_proj_b.reshape(1, D)
    wfc = fc_w.T; bfc = fc_b.reshape(1, 4 * D)                       # (D, 4D)
    wpr = proj_w.T; bpr = proj_b.reshape(1, D)                       # (4D, D)

    bf16 = jnp.bfloat16
    return (ln1g, ln1b,
            wqkv.astype(bf16), bqkv,
            wo.astype(bf16), bo,
            ln2g, ln2b,
            wfc.astype(bf16), bfc,
            wpr.astype(bf16), bpr)


def transformer_forward(x_lbd, x_mask, block_params_list, num_heads):
    """x_lbd: (L, N, D) seq-first; x_mask: (N, L) bool key-padding mask or None."""
    x_bld = jnp.transpose(x_lbd, (1, 0, 2))          # (N, L, D)
    B, L, _ = x_bld.shape
    if x_mask is None:
        mask_bias = jnp.zeros((B, 1, L), jnp.float32)
    else:
        # NOTE: if an entire row is masked, this yields a uniform softmax over the
        # masked keys, whereas PyTorch MultiheadAttention would return NaN.
        mask_bias = jnp.where(x_mask.astype(bool), NEG_BIG, 0.0)
        mask_bias = mask_bias.astype(jnp.float32).reshape(B, 1, L)
    for params in block_params_list:
        x_bld = residual_attention_block(x_bld, mask_bias, params, num_heads)
    return jnp.transpose(x_bld, (1, 0, 2))           # back to (L, N, D)


if __name__ == "__main__":
    # small config: width=32, heads=4, layers=3  ->  layers-1 = 2 residual blocks
    WIDTH, HEADS, LAYERS = 32, 4, 3
    SEQ, BATCH = 8, 2

    key = jax.random.PRNGKey(0)
    kx, kp = jax.random.split(key)
    x = jax.random.normal(kx, (SEQ, BATCH, WIDTH), jnp.float32)  # (L, N, D)

    # key padding mask: last 2 positions of batch element 1 are padding
    x_mask = jnp.zeros((BATCH, SEQ), jnp.bool_).at[1, SEQ - 2:].set(True)

    block_keys = jax.random.split(kp, LAYERS - 1)
    block_params = [make_block_params(k, WIDTH, HEADS) for k in block_keys]

    fwd = jax.jit(functools.partial(transformer_forward,
                                    block_params_list=block_params,
                                    num_heads=HEADS))
    out = fwd(x, x_mask)
    jax.block_until_ready(out)
    assert out.shape == (SEQ, BATCH, WIDTH) and out.dtype == jnp.float32
    print("KERNEL_OK")
</pallas_src>

<mosaic_0001>
module attributes {stable_mosaic.version = 11 : i64} {
  func.func @resblock_kernel(%arg0: i32, %arg1: memref<1x8x32xf32, #tpu.memory_space<vmem>>, %arg2: memref<1x1x8xf32, #tpu.memory_space<vmem>>, %arg3: memref<1x32xf32, #tpu.memory_space<vmem>>, %arg4: memref<1x32xf32, #tpu.memory_space<vmem>>, %arg5: memref<32x96xbf16, #tpu.memory_space<vmem>>, %arg6: memref<1x96xf32, #tpu.memory_space<vmem>>, %arg7: memref<32x32xbf16, #tpu.memory_space<vmem>>, %arg8: memref<1x32xf32, #tpu.memory_space<vmem>>, %arg9: memref<1x32xf32, #tpu.memory_space<vmem>>, %arg10: memref<1x32xf32, #tpu.memory_space<vmem>>, %arg11: memref<32x128xbf16, #tpu.memory_space<vmem>>, %arg12: memref<1x128xf32, #tpu.memory_space<vmem>>, %arg13: memref<128x32xbf16, #tpu.memory_space<vmem>>, %arg14: memref<1x32xf32, #tpu.memory_space<vmem>>, %arg15: memref<1x8x32xf32, #tpu.memory_space<vmem>>) attributes {dimension_semantics = [#tpu.dimension_semantics<parallel>], iteration_bounds = array<i64: 2>, scalar_prefetch = 0 : i64, scratch_operands = 0 : i64, tpu.core_type = #tpu.core_type<tc>, window_params = [{transform_indices = @transform_0, window_bounds = array<i64: 1, 8, 32>}, {transform_indices = @transform_1, window_bounds = array<i64: 1, 1, 8>}, {pipeline_mode = #tpu.pipeline_mode<synchronous>, transform_indices = @transform_2, window_bounds = array<i64: 1, 32>}, {pipeline_mode = #tpu.pipeline_mode<synchronous>, transform_indices = @transform_3, window_bounds = array<i64: 1, 32>}, {pipeline_mode = #tpu.pipeline_mode<synchronous>, transform_indices = @transform_4, window_bounds = array<i64: 32, 96>}, {pipeline_mode = #tpu.pipeline_mode<synchronous>, transform_indices = @transform_5, window_bounds = array<i64: 1, 96>}, {pipeline_mode = #tpu.pipeline_mode<synchronous>, transform_indices = @transform_6, window_bounds = array<i64: 32, 32>}, {pipeline_mode = #tpu.pipeline_mode<synchronous>, transform_indices = @transform_7, window_bounds = array<i64: 1, 32>}, {pipeline_mode = #tpu.pipeline_mode<synchronous>, transform_indices = @transform_8, window_bounds = array<i64: 1, 32>}, {pipeline_mode = #tpu.pipeline_mode<synchronous>, transform_indices = @transform_9, window_bounds = array<i64: 1, 32>}, {pipeline_mode = #tpu.pipeline_mode<synchronous>, transform_indices = @transform_10, window_bounds = array<i64: 32, 128>}, {pipeline_mode = #tpu.pipeline_mode<synchronous>, transform_indices = @transform_11, window_bounds = array<i64: 1, 128>}, {pipeline_mode = #tpu.pipeline_mode<synchronous>, transform_indices = @transform_12, window_bounds = array<i64: 128, 32>}, {pipeline_mode = #tpu.pipeline_mode<synchronous>, transform_indices = @transform_13, window_bounds = array<i64: 1, 32>}, {transform_indices = @transform_14, window_bounds = array<i64: 1, 8, 32>}]} {
    %c0 = arith.constant 0 : index
    %c0_0 = arith.constant 0 : index
    %c0_1 = arith.constant 0 : index
    %0 = vector.load %arg1[%c0, %c0_0, %c0_1] : memref<1x8x32xf32, #tpu.memory_space<vmem>>, vector<1x8x32xf32>
    %1 = vector.shape_cast %0 : vector<1x8x32xf32> to vector<8x32xf32>
    %c0_2 = arith.constant 0 : index
    %c0_3 = arith.constant 0 : index
    %c0_4 = arith.constant 0 : index
    %2 = vector.load %arg2[%c0_2, %c0_3, %c0_4] : memref<1x1x8xf32, #tpu.memory_space<vmem>>, vector<1x1x8xf32>
    %3 = vector.shape_cast %2 : vector<1x1x8xf32> to vector<1x8xf32>
    %cst = arith.constant dense<0.000000e+00> : vector<8xf32>
    %4 = vector.multi_reduction <add>, %1, %cst [1] : vector<8x32xf32> to vector<8xf32>
    %5 = vector.shape_cast %4 : vector<8xf32> to vector<8x1xf32>
    %cst_5 = arith.constant 3.200000e+01 : f32
    %6 = vector.broadcast %cst_5 : f32 to vector<8x1xf32>
    %7 = arith.divf %5, %6 : vector<8x1xf32>
    %8 = vector.broadcast %7 : vector<8x1xf32> to vector<8x32xf32>
    %9 = arith.subf %1, %8 : vector<8x32xf32>
    %10 = arith.mulf %9, %9 : vector<8x32xf32>
    %cst_6 = arith.constant dense<0.000000e+00> : vector<8xf32>
    %11 = vector.multi_reduction <add>, %10, %cst_6 [1] : vector<8x32xf32> to vector<8xf32>
    %12 = vector.shape_cast %11 : vector<8xf32> to vector<8x1xf32>
    %cst_7 = arith.constant 3.200000e+01 : f32
    %13 = vector.broadcast %cst_7 : f32 to vector<8x1xf32>
    %14 = arith.divf %12, %13 : vector<8x1xf32>
    %15 = vector.broadcast %7 : vector<8x1xf32> to vector<8x32xf32>
    %16 = arith.subf %1, %15 : vector<8x32xf32>
    %cst_8 = arith.constant 9.99999974E-6 : f32
    %17 = vector.broadcast %cst_8 : f32 to vector<8x1xf32>
    %18 = arith.addf %14, %17 : vector<8x1xf32>
    %19 = math.rsqrt %18 : vector<8x1xf32>
    %20 = vector.broadcast %19 : vector<8x1xf32> to vector<8x32xf32>
    %21 = arith.mulf %16, %20 : vector<8x32xf32>
    %c0_9 = arith.constant 0 : index
    %c0_10 = arith.constant 0 : index
    %22 = vector.load %arg3[%c0_9, %c0_10] : memref<1x32xf32, #tpu.memory_space<vmem>>, vector<1x32xf32>
    %23 = vector.broadcast %22 : vector<1x32xf32> to vector<8x32xf32>
    %24 = arith.mulf %21, %23 : vector<8x32xf32>
    %c0_11 = arith.constant 0 : index
    %c0_12 = arith.constant 0 : index
    %25 = vector.load %arg4[%c0_11, %c0_12] : memref<1x32xf32, #tpu.memory_space<vmem>>, vector<1x32xf32>
    %26 = vector.broadcast %25 : vector<1x32xf32> to vector<8x32xf32>
    %27 = arith.addf %24, %26 : vector<8x32xf32>
    %28 = arith.truncf %27 : vector<8x32xf32> to vector<8x32xbf16>
    %c0_13 = arith.constant 0 : index
    %c0_14 = arith.constant 0 : index
    %29 = vector.load %arg5[%c0_13, %c0_14] : memref<32x96xbf16, #tpu.memory_space<vmem>>, vector<32x96xbf16>
    %cst_15 = arith.constant dense<0.000000e+00> : vector<8x96xf32>
    %30 = tpu.matmul %28, %29, %cst_15 {dimension_numbers = #tpu.dot_dimension_numbers<[1], [0], [0], [1], [0, 0, 1, 1], [], []>} : vector<8x32xbf16>, vector<32x96xbf16>, vector<8x96xf32> -> vector<8x96xf32>
    %c0_16 = arith.constant 0 : index
    %c0_17 = arith.constant 0 : index
    %31 = vector.load %arg6[%c0_16, %c0_17] : memref<1x96xf32, #tpu.memory_space<vmem>>, vector<1x96xf32>
    %32 = vector.broadcast %31 : vector<1x96xf32> to vector<8x96xf32>
    %33 = arith.addf %30, %32 : vector<8x96xf32>
    %34 = vector.extract_strided_slice %33 {offsets = [0, 0], sizes = [8, 8], strides = [1, 1]} : vector<8x96xf32> to vector<8x8xf32>
    %35 = arith.truncf %34 : vector<8x8xf32> to vector<8x8xbf16>
    %36 = vector.extract_strided_slice %33 {offsets = [0, 32], sizes = [8, 8], strides = [1, 1]} : vector<8x96xf32> to vector<8x8xf32>
    %37 = arith.truncf %36 : vector<8x8xf32> to vector<8x8xbf16>
    %38 = vector.extract_strided_slice %33 {offsets = [0, 64], sizes = [8, 8], strides = [1, 1]} : vector<8x96xf32> to vector<8x8xf32>
    %39 = arith.truncf %38 : vector<8x8xf32> to vector<8x8xbf16>
    %cst_18 = arith.constant dense<0.000000e+00> : vector<8x8xf32>
    %40 = tpu.matmul %35, %37, %cst_18 {dimension_numbers = #tpu.dot_dimension_numbers<[1], [1], [0], [0], [0, 0, 1, 0], [], []>} : vector<8x8xbf16>, vector<8x8xbf16>, vector<8x8xf32> -> vector<8x8xf32>
    %41 = vector.broadcast %3 : vector<1x8xf32> to vector<8x8xf32>
    %42 = arith.addf %40, %41 : vector<8x8xf32>
    %cst_19 = arith.constant dense<0xFF800000> : vector<8xf32>
    %43 = vector.multi_reduction <maximumf>, %42, %cst_19 [1] : vector<8x8xf32> to vector<8xf32>
    %44 = vector.shape_cast %43 : vector<8xf32> to vector<8x1xf32>
    %45 = vector.broadcast %44 : vector<8x1xf32> to vector<8x8xf32>
    %46 = arith.subf %42, %45 : vector<8x8xf32>
    %47 = math.exp %46 : vector<8x8xf32>
    %cst_20 = arith.constant dense<0.000000e+00> : vector<8xf32>
    %48 = vector.multi_reduction <add>, %47, %cst_20 [1] : vector<8x8xf32> to vector<8xf32>
    %49 = vector.shape_cast %48 : vector<8xf32> to vector<8x1xf32>
    %50 = arith.truncf %47 : vector<8x8xf32> to vector<8x8xbf16>
    %cst_21 = arith.constant dense<0.000000e+00> : vector<8x8xf32>
    %51 = tpu.matmul %50, %39, %cst_21 {dimension_numbers = #tpu.dot_dimension_numbers<[1], [0], [0], [1], [0, 0, 1, 1], [], []>} : vector<8x8xbf16>, vector<8x8xbf16>, vector<8x8xf32> -> vector<8x8xf32>
    %52 = tpu.reciprocal %49 {approx = true} : vector<8x1xf32> -> vector<8x1xf32>
    %53 = vector.broadcast %52 : vector<8x1xf32> to vector<8x8xf32>
    %54 = arith.mulf %51, %53 : vector<8x8xf32>
    %55 = vector.extract_strided_slice %33 {offsets = [0, 8], sizes = [8, 8], strides = [1, 1]} : vector<8x96xf32> to vector<8x8xf32>
    %56 = arith.truncf %55 : vector<8x8xf32> to vector<8x8xbf16>
    %57 = vector.extract_strided_slice %33 {offsets = [0, 40], sizes = [8, 8], strides = [1, 1]} : vector<8x96xf32> to vector<8x8xf32>
    %58 = arith.truncf %57 : vector<8x8xf32> to vector<8x8xbf16>
    %59 = vector.extract_strided_slice %33 {offsets = [0, 72], sizes = [8, 8], strides = [1, 1]} : vector<8x96xf32> to vector<8x8xf32>
    %60 = arith.truncf %59 : vector<8x8xf32> to vector<8x8xbf16>
    %cst_22 = arith.constant dense<0.000000e+00> : vector<8x8xf32>
    %61 = tpu.matmul %56, %58, %cst_22 {dimension_numbers = #tpu.dot_dimension_numbers<[1], [1], [0], [0], [0, 0, 1, 0], [], []>} : vector<8x8xbf16>, vector<8x8xbf16>, vector<8x8xf32> -> vector<8x8xf32>
    %62 = vector.broadcast %3 : vector<1x8xf32> to vector<8x8xf32>
    %63 = arith.addf %61, %62 : vector<8x8xf32>
    %cst_23 = arith.constant dense<0xFF800000> : vector<8xf32>
    %64 = vector.multi_reduction <maximumf>, %63, %cst_23 [1] : vector<8x8xf32> to vector<8xf32>
    %65 = vector.shape_cast %64 : vector<8xf32> to vector<8x1xf32>
    %66 = vector.broadcast %65 : vector<8x1xf32> to vector<8x8xf32>
    %67 = arith.subf %63, %66 : vector<8x8xf32>
    %68 = math.exp %67 : vector<8x8xf32>
    %cst_24 = arith.constant dense<0.000000e+00> : vector<8xf32>
    %69 = vector.multi_reduction <add>, %68, %cst_24 [1] : vector<8x8xf32> to vector<8xf32>
    %70 = vector.shape_cast %69 : vector<8xf32> to vector<8x1xf32>
    %71 = arith.truncf %68 : vector<8x8xf32> to vector<8x8xbf16>
    %cst_25 = arith.constant dense<0.000000e+00> : vector<8x8xf32>
    %72 = tpu.matmul %71, %60, %cst_25 {dimension_numbers = #tpu.dot_dimension_numbers<[1], [0], [0], [1], [0, 0, 1, 1], [], []>} : vector<8x8xbf16>, vector<8x8xbf16>, vector<8x8xf32> -> vector<8x8xf32>
    %73 = tpu.reciprocal %70 {approx = true} : vector<8x1xf32> -> vector<8x1xf32>
    %74 = vector.broadcast %73 : vector<8x1xf32> to vector<8x8xf32>
    %75 = arith.mulf %72, %74 : vector<8x8xf32>
    %76 = vector.extract_strided_slice %33 {offsets = [0, 16], sizes = [8, 8], strides = [1, 1]} : vector<8x96xf32> to vector<8x8xf32>
    %77 = arith.truncf %76 : vector<8x8xf32> to vector<8x8xbf16>
    %78 = vector.extract_strided_slice %33 {offsets = [0, 48], sizes = [8, 8], strides = [1, 1]} : vector<8x96xf32> to vector<8x8xf32>
    %79 = arith.truncf %78 : vector<8x8xf32> to vector<8x8xbf16>
    %80 = vector.extract_strided_slice %33 {offsets = [0, 80], sizes = [8, 8], strides = [1, 1]} : vector<8x96xf32> to vector<8x8xf32>
    %81 = arith.truncf %80 : vector<8x8xf32> to vector<8x8xbf16>
    %cst_26 = arith.constant dense<0.000000e+00> : vector<8x8xf32>
    %82 = tpu.matmul %77, %79, %cst_26 {dimension_numbers = #tpu.dot_dimension_numbers<[1], [1], [0], [0], [0, 0, 1, 0], [], []>} : vector<8x8xbf16>, vector<8x8xbf16>, vector<8x8xf32> -> vector<8x8xf32>
    %83 = vector.broadcast %3 : vector<1x8xf32> to vector<8x8xf32>
    %84 = arith.addf %82, %83 : vector<8x8xf32>
    %cst_27 = arith.constant dense<0xFF800000> : vector<8xf32>
    %85 = vector.multi_reduction <maximumf>, %84, %cst_27 [1] : vector<8x8xf32> to vector<8xf32>
    %86 = vector.shape_cast %85 : vector<8xf32> to vector<8x1xf32>
    %87 = vector.broadcast %86 : vector<8x1xf32> to vector<8x8xf32>
    %88 = arith.subf %84, %87 : vector<8x8xf32>
    %89 = math.exp %88 : vector<8x8xf32>
    %cst_28 = arith.constant dense<0.000000e+00> : vector<8xf32>
    %90 = vector.multi_reduction <add>, %89, %cst_28 [1] : vector<8x8xf32> to vector<8xf32>
    %91 = vector.shape_cast %90 : vector<8xf32> to vector<8x1xf32>
    %92 = arith.truncf %89 : vector<8x8xf32> to vector<8x8xbf16>
    %cst_29 = arith.constant dense<0.000000e+00> : vector<8x8xf32>
    %93 = tpu.matmul %92, %81, %cst_29 {dimension_numbers = #tpu.dot_dimension_numbers<[1], [0], [0], [1], [0, 0, 1, 1], [], []>} : vector<8x8xbf16>, vector<8x8xbf16>, vector<8x8xf32> -> vector<8x8xf32>
    %94 = tpu.reciprocal %91 {approx = true} : vector<8x1xf32> -> vector<8x1xf32>
    %95 = vector.broadcast %94 : vector<8x1xf32> to vector<8x8xf32>
    %96 = arith.mulf %93, %95 : vector<8x8xf32>
    %97 = vector.extract_strided_slice %33 {offsets = [0, 24], sizes = [8, 8], strides = [1, 1]} : vector<8x96xf32> to vector<8x8xf32>
    %98 = arith.truncf %97 : vector<8x8xf32> to vector<8x8xbf16>
    %99 = vector.extract_strided_slice %33 {offsets = [0, 56], sizes = [8, 8], strides = [1, 1]} : vector<8x96xf32> to vector<8x8xf32>
    %100 = arith.truncf %99 : vector<8x8xf32> to vector<8x8xbf16>
    %101 = vector.extract_strided_slice %33 {offsets = [0, 88], sizes = [8, 8], strides = [1, 1]} : vector<8x96xf32> to vector<8x8xf32>
    %102 = arith.truncf %101 : vector<8x8xf32> to vector<8x8xbf16>
    %cst_30 = arith.constant dense<0.000000e+00> : vector<8x8xf32>
    %103 = tpu.matmul %98, %100, %cst_30 {dimension_numbers = #tpu.dot_dimension_numbers<[1], [1], [0], [0], [0, 0, 1, 0], [], []>} : vector<8x8xbf16>, vector<8x8xbf16>, vector<8x8xf32> -> vector<8x8xf32>
    %104 = vector.broadcast %3 : vector<1x8xf32> to vector<8x8xf32>
    %105 = arith.addf %103, %104 : vector<8x8xf32>
    %cst_31 = arith.constant dense<0xFF800000> : vector<8xf32>
    %106 = vector.multi_reduction <maximumf>, %105, %cst_31 [1] : vector<8x8xf32> to vector<8xf32>
    %107 = vector.shape_cast %106 : vector<8xf32> to vector<8x1xf32>
    %108 = vector.broadcast %107 : vector<8x1xf32> to vector<8x8xf32>
    %109 = arith.subf %105, %108 : vector<8x8xf32>
    %110 = math.exp %109 : vector<8x8xf32>
    %cst_32 = arith.constant dense<0.000000e+00> : vector<8xf32>
    %111 = vector.multi_reduction <add>, %110, %cst_32 [1] : vector<8x8xf32> to vector<8xf32>
    %112 = vector.shape_cast %111 : vector<8xf32> to vector<8x1xf32>
    %113 = arith.truncf %110 : vector<8x8xf32> to vector<8x8xbf16>
    %cst_33 = arith.constant dense<0.000000e+00> : vector<8x8xf32>
    %114 = tpu.matmul %113, %102, %cst_33 {dimension_numbers = #tpu.dot_dimension_numbers<[1], [0], [0], [1], [0, 0, 1, 1], [], []>} : vector<8x8xbf16>, vector<8x8xbf16>, vector<8x8xf32> -> vector<8x8xf32>
    %115 = tpu.reciprocal %112 {approx = true} : vector<8x1xf32> -> vector<8x1xf32>
    %116 = vector.broadcast %115 : vector<8x1xf32> to vector<8x8xf32>
    %117 = arith.mulf %114, %116 : vector<8x8xf32>
    %118 = tpu.concatenate %54, %75, %96, %117 in 1 : vector<8x8xf32>, vector<8x8xf32>, vector<8x8xf32>, vector<8x8xf32> -> vector<8x32xf32>
    %119 = arith.truncf %118 : vector<8x32xf32> to vector<8x32xbf16>
    %c0_34 = arith.constant 0 : index
    %c0_35 = arith.constant 0 : index
    %120 = vector.load %arg7[%c0_34, %c0_35] : memref<32x32xbf16, #tpu.memory_space<vmem>>, vector<32x32xbf16>
    %cst_36 = arith.constant dense<0.000000e+00> : vector<8x32xf32>
    %121 = tpu.matmul %119, %120, %cst_36 {dimension_numbers = #tpu.dot_dimension_numbers<[1], [0], [0], [1], [0, 0, 1, 1], [], []>} : vector<8x32xbf16>, vector<32x32xbf16>, vector<8x32xf32> -> vector<8x32xf32>
    %c0_37 = arith.constant 0 : index
    %c0_38 = arith.constant 0 : index
    %122 = vector.load %arg8[%c0_37, %c0_38] : memref<1x32xf32, #tpu.memory_space<vmem>>, vector<1x32xf32>
    %123 = vector.broadcast %122 : vector<1x32xf32> to vector<8x32xf32>
    %124 = arith.addf %121, %123 : vector<8x32xf32>
    %125 = arith.addf %1, %124 : vector<8x32xf32>
    %cst_39 = arith.constant dense<0.000000e+00> : vector<8xf32>
    %126 = vector.multi_reduction <add>, %125, %cst_39 [1] : vector<8x32xf32> to vector<8xf32>
    %127 = vector.shape_cast %126 : vector<8xf32> to vector<8x1xf32>
    %cst_40 = arith.constant 3.200000e+01 : f32
    %128 = vector.broadcast %cst_40 : f32 to vector<8x1xf32>
    %129 = arith.divf %127, %128 : vector<8x1xf32>
    %130 = vector.broadcast %129 : vector<8x1xf32> to vector<8x32xf32>
    %131 = arith.subf %125, %130 : vector<8x32xf32>
    %132 = arith.mulf %131, %131 : vector<8x32xf32>
    %cst_41 = arith.constant dense<0.000000e+00> : vector<8xf32>
    %133 = vector.multi_reduction <add>, %132, %cst_41 [1] : vector<8x32xf32> to vector<8xf32>
    %134 = vector.shape_cast %133 : vector<8xf32> to vector<8x1xf32>
    %cst_42 = arith.constant 3.200000e+01 : f32
    %135 = vector.broadcast %cst_42 : f32 to vector<8x1xf32>
    %136 = arith.divf %134, %135 : vector<8x1xf32>
    %137 = vector.broadcast %129 : vector<8x1xf32> to vector<8x32xf32>
    %138 = arith.subf %125, %137 : vector<8x32xf32>
    %cst_43 = arith.constant 9.99999974E-6 : f32
    %139 = vector.broadcast %cst_43 : f32 to vector<8x1xf32>
    %140 = arith.addf %136, %139 : vector<8x1xf32>
    %141 = math.rsqrt %140 : vector<8x1xf32>
    %142 = vector.broadcast %141 : vector<8x1xf32> to vector<8x32xf32>
    %143 = arith.mulf %138, %142 : vector<8x32xf32>
    %c0_44 = arith.constant 0 : index
    %c0_45 = arith.constant 0 : index
    %144 = vector.load %arg9[%c0_44, %c0_45] : memref<1x32xf32, #tpu.memory_space<vmem>>, vector<1x32xf32>
    %145 = vector.broadcast %144 : vector<1x32xf32> to vector<8x32xf32>
    %146 = arith.mulf %143, %145 : vector<8x32xf32>
    %c0_46 = arith.constant 0 : index
    %c0_47 = arith.constant 0 : index
    %147 = vector.load %arg10[%c0_46, %c0_47] : memref<1x32xf32, #tpu.memory_space<vmem>>, vector<1x32xf32>
    %148 = vector.broadcast %147 : vector<1x32xf32> to vector<8x32xf32>
    %149 = arith.addf %146, %148 : vector<8x32xf32>
    %150 = arith.truncf %149 : vector<8x32xf32> to vector<8x32xbf16>
    %c0_48 = arith.constant 0 : index
    %c0_49 = arith.constant 0 : index
    %151 = vector.load %arg11[%c0_48, %c0_49] : memref<32x128xbf16, #tpu.memory_space<vmem>>, vector<32x128xbf16>
    %cst_50 = arith.constant dense<0.000000e+00> : vector<8x128xf32>
    %152 = tpu.matmul %150, %151, %cst_50 {dimension_numbers = #tpu.dot_dimension_numbers<[1], [0], [0], [1], [0, 0, 1, 1], [], []>} : vector<8x32xbf16>, vector<32x128xbf16>, vector<8x128xf32> -> vector<8x128xf32>
    %c0_51 = arith.constant 0 : index
    %c0_52 = arith.constant 0 : index
    %153 = vector.load %arg12[%c0_51, %c0_52] : memref<1x128xf32, #tpu.memory_space<vmem>>, vector<1x128xf32>
    %154 = vector.broadcast %153 : vector<1x128xf32> to vector<8x128xf32>
    %155 = arith.addf %152, %154 : vector<8x128xf32>
    %cst_53 = arith.constant 1.702000e+00 : f32
    %156 = vector.broadcast %cst_53 : f32 to vector<8x128xf32>
    %157 = arith.mulf %156, %155 : vector<8x128xf32>
    %158 = arith.negf %157 : vector<8x128xf32>
    %159 = math.exp %158 : vector<8x128xf32>
    %cst_54 = arith.constant 1.000000e+00 : f32
    %160 = vector.broadcast %cst_54 : f32 to vector<8x128xf32>
    %161 = arith.addf %160, %159 : vector<8x128xf32>
    %162 = arith.divf %160, %161 : vector<8x128xf32>
    %163 = arith.mulf %155, %162 : vector<8x128xf32>
    %164 = arith.truncf %163 : vector<8x128xf32> to vector<8x128xbf16>
    %c0_55 = arith.constant 0 : index
    %c0_56 = arith.constant 0 : index
    %165 = vector.load %arg13[%c0_55, %c0_56] : memref<128x32xbf16, #tpu.memory_space<vmem>>, vector<128x32xbf16>
    %cst_57 = arith.constant dense<0.000000e+00> : vector<8x32xf32>
    %166 = tpu.matmul %164, %165, %cst_57 {dimension_numbers = #tpu.dot_dimension_numbers<[1], [0], [0], [1], [0, 0, 1, 1], [], []>} : vector<8x128xbf16>, vector<128x32xbf16>, vector<8x32xf32> -> vector<8x32xf32>
    %c0_58 = arith.constant 0 : index
    %c0_59 = arith.constant 0 : index
    %167 = vector.load %arg14[%c0_58, %c0_59] : memref<1x32xf32, #tpu.memory_space<vmem>>, vector<1x32xf32>
    %168 = vector.broadcast %167 : vector<1x32xf32> to vector<8x32xf32>
    %169 = arith.addf %166, %168 : vector<8x32xf32>
    %170 = arith.addf %125, %169 : vector<8x32xf32>
    %c0_60 = arith.constant 0 : index
    %c0_61 = arith.constant 0 : index
    %c0_62 = arith.constant 0 : index
    %171 = vector.load %arg15[%c0_60, %c0_61, %c0_62] : memref<1x8x32xf32, #tpu.memory_space<vmem>>, vector<1x8x32xf32>
    %172 = vector.shape_cast %171 : vector<1x8x32xf32> to vector<8x32xf32>
    %173 = vector.shape_cast %170 : vector<8x32xf32> to vector<1x8x32xf32>
    tpu.vector_store %arg15[%c0_60, %c0_61, %c0_62], %173 {strides = array<i32>} : memref<1x8x32xf32, #tpu.memory_space<vmem>>, vector<1x8x32xf32>,
    return
  }
  func.func @transform_0(%arg0: i32) -> (i32, i32, i32) {
    %c0_i32 = arith.constant 0 : i32
    %c0_i32_0 = arith.constant 0 : i32
    %c0_i32_1 = arith.constant 0 : i32
    return %arg0, %c0_i32, %c0_i32_0 : i32, i32, i32
  }
  func.func @transform_1(%arg0: i32) -> (i32, i32, i32) {
    %c0_i32 = arith.constant 0 : i32
    %c0_i32_0 = arith.constant 0 : i32
    %c0_i32_1 = arith.constant 0 : i32
    return %arg0, %c0_i32, %c0_i32_0 : i32, i32, i32
  }
  func.func @transform_2(%arg0: i32) -> (i32, i32) {
    %c0_i32 = arith.constant 0 : i32
    %c0_i32_0 = arith.constant 0 : i32
    %c0_i32_1 = arith.constant 0 : i32
    return %c0_i32, %c0_i32_0 : i32, i32
  }
  func.func @transform_3(%arg0: i32) -> (i32, i32) {
    %c0_i32 = arith.constant 0 : i32
    %c0_i32_0 = arith.constant 0 : i32
    %c0_i32_1 = arith.constant 0 : i32
    return %c0_i32, %c0_i32_0 : i32, i32
  }
  func.func @transform_4(%arg0: i32) -> (i32, i32) {
    %c0_i32 = arith.constant 0 : i32
    %c0_i32_0 = arith.constant 0 : i32
    %c0_i32_1 = arith.constant 0 : i32
    return %c0_i32, %c0_i32_0 : i32, i32
  }
  func.func @transform_5(%arg0: i32) -> (i32, i32) {
    %c0_i32 = arith.constant 0 : i32
    %c0_i32_0 = arith.constant 0 : i32
    %c0_i32_1 = arith.constant 0 : i32
    return %c0_i32, %c0_i32_0 : i32, i32
  }
  func.func @transform_6(%arg0: i32) -> (i32, i32) {
    %c0_i32 = arith.constant 0 : i32
    %c0_i32_0 = arith.constant 0 : i32
    %c0_i32_1 = arith.constant 0 : i32
    return %c0_i32, %c0_i32_0 : i32, i32
  }
  func.func @transform_7(%arg0: i32) -> (i32, i32) {
    %c0_i32 = arith.constant 0 : i32
    %c0_i32_0 = arith.constant 0 : i32
    %c0_i32_1 = arith.constant 0 : i32
    return %c0_i32, %c0_i32_0 : i32, i32
  }
  func.func @transform_8(%arg0: i32) -> (i32, i32) {
    %c0_i32 = arith.constant 0 : i32
    %c0_i32_0 = arith.constant 0 : i32
    %c0_i32_1 = arith.constant 0 : i32
    return %c0_i32, %c0_i32_0 : i32, i32
  }
  func.func @transform_9(%arg0: i32) -> (i32, i32) {
    %c0_i32 = arith.constant 0 : i32
    %c0_i32_0 = arith.constant 0 : i32
    %c0_i32_1 = arith.constant 0 : i32
    return %c0_i32, %c0_i32_0 : i32, i32
  }
  func.func @transform_10(%arg0: i32) -> (i32, i32) {
    %c0_i32 = arith.constant 0 : i32
    %c0_i32_0 = arith.constant 0 : i32
    %c0_i32_1 = arith.constant 0 : i32
    return %c0_i32, %c0_i32_0 : i32, i32
  }
  func.func @transform_11(%arg0: i32) -> (i32, i32) {
    %c0_i32 = arith.constant 0 : i32
    %c0_i32_0 = arith.constant 0 : i32
    %c0_i32_1 = arith.constant 0 : i32
    return %c0_i32, %c0_i32_0 : i32, i32
  }
  func.func @transform_12(%arg0: i32) -> (i32, i32) {
    %c0_i32 = arith.constant 0 : i32
    %c0_i32_0 = arith.constant 0 : i32
    %c0_i32_1 = arith.constant 0 : i32
    return %c0_i32, %c0_i32_0 : i32, i32
  }
  func.func @transform_13(%arg0: i32) -> (i32, i32) {
    %c0_i32 = arith.constant 0 : i32
    %c0_i32_0 = arith.constant 0 : i32
    %c0_i32_1 = arith.constant 0 : i32
    return %c0_i32, %c0_i32_0 : i32, i32
  }
  func.func @transform_14(%arg0: i32) -> (i32, i32, i32) {
    %c0_i32 = arith.constant 0 : i32
    %c0_i32_0 = arith.constant 0 : i32
    %c0_i32_1 = arith.constant 0 : i32
    return %arg0, %c0_i32, %c0_i32_0 : i32, i32, i32
  }
}

module attributes {stable_mosaic.version = 11 : i64} {
  func.func @resblock_kernel(%arg0: i32, %arg1: memref<1x8x32xf32, #tpu.memory_space<vmem>>, %arg2: memref<1x1x8xf32, #tpu.memory_space<vmem>>, %arg3: memref<1x32xf32, #tpu.memory_space<vmem>>, %arg4: memref<1x32xf32, #tpu.memory_space<vmem>>, %arg5: memref<32x96xbf16, #tpu.memory_space<vmem>>, %arg6: memref<1x96xf32, #tpu.memory_space<vmem>>, %arg7: memref<32x32xbf16, #tpu.memory_space<vmem>>, %arg8: memref<1x32xf32, #tpu.memory_space<vmem>>, %arg9: memref<1x32xf32, #tpu.memory_space<vmem>>, %arg10: memref<1x32xf32, #tpu.memory_space<vmem>>, %arg11: memref<32x128xbf16, #tpu.memory_space<vmem>>, %arg12: memref<1x128xf32, #tpu.memory_space<vmem>>, %arg13: memref<128x32xbf16, #tpu.memory_space<vmem>>, %arg14: memref<1x32xf32, #tpu.memory_space<vmem>>, %arg15: memref<1x8x32xf32, #tpu.memory_space<vmem>>) attributes {dimension_semantics = [#tpu.dimension_semantics<parallel>], iteration_bounds = array<i64: 2>, scalar_prefetch = 0 : i64, scratch_operands = 0 : i64, tpu.core_type = #tpu.core_type<tc>, window_params = [{transform_indices = @transform_0, window_bounds = array<i64: 1, 8, 32>}, {transform_indices = @transform_1, window_bounds = array<i64: 1, 1, 8>}, {pipeline_mode = #tpu.pipeline_mode<synchronous>, transform_indices = @transform_2, window_bounds = array<i64: 1, 32>}, {pipeline_mode = #tpu.pipeline_mode<synchronous>, transform_indices = @transform_3, window_bounds = array<i64: 1, 32>}, {pipeline_mode = #tpu.pipeline_mode<synchronous>, transform_indices = @transform_4, window_bounds = array<i64: 32, 96>}, {pipeline_mode = #tpu.pipeline_mode<synchronous>, transform_indices = @transform_5, window_bounds = array<i64: 1, 96>}, {pipeline_mode = #tpu.pipeline_mode<synchronous>, transform_indices = @transform_6, window_bounds = array<i64: 32, 32>}, {pipeline_mode = #tpu.pipeline_mode<synchronous>, transform_indices = @transform_7, window_bounds = array<i64: 1, 32>}, {pipeline_mode = #tpu.pipeline_mode<synchronous>, transform_indices = @transform_8, window_bounds = array<i64: 1, 32>}, {pipeline_mode = #tpu.pipeline_mode<synchronous>, transform_indices = @transform_9, window_bounds = array<i64: 1, 32>}, {pipeline_mode = #tpu.pipeline_mode<synchronous>, transform_indices = @transform_10, window_bounds = array<i64: 32, 128>}, {pipeline_mode = #tpu.pipeline_mode<synchronous>, transform_indices = @transform_11, window_bounds = array<i64: 1, 128>}, {pipeline_mode = #tpu.pipeline_mode<synchronous>, transform_indices = @transform_12, window_bounds = array<i64: 128, 32>}, {pipeline_mode = #tpu.pipeline_mode<synchronous>, transform_indices = @transform_13, window_bounds = array<i64: 1, 32>}, {transform_indices = @transform_14, window_bounds = array<i64: 1, 8, 32>}]} {
    %c0 = arith.constant 0 : index
    %c0_0 = arith.constant 0 : index
    %c0_1 = arith.constant 0 : index
    %0 = vector.load %arg1[%c0, %c0_0, %c0_1] : memref<1x8x32xf32, #tpu.memory_space<vmem>>, vector<1x8x32xf32>
    %1 = vector.shape_cast %0 : vector<1x8x32xf32> to vector<8x32xf32>
    %c0_2 = arith.constant 0 : index
    %c0_3 = arith.constant 0 : index
    %c0_4 = arith.constant 0 : index
    %2 = vector.load %arg2[%c0_2, %c0_3, %c0_4] : memref<1x1x8xf32, #tpu.memory_space<vmem>>, vector<1x1x8xf32>
    %3 = vector.shape_cast %2 : vector<1x1x8xf32> to vector<1x8xf32>
    %cst = arith.constant dense<0.000000e+00> : vector<8xf32>
    %4 = vector.multi_reduction <add>, %1, %cst [1] : vector<8x32xf32> to vector<8xf32>
    %5 = vector.shape_cast %4 : vector<8xf32> to vector<8x1xf32>
    %cst_5 = arith.constant 3.200000e+01 : f32
    %6 = vector.broadcast %cst_5 : f32 to vector<8x1xf32>
    %7 = arith.divf %5, %6 : vector<8x1xf32>
    %8 = vector.broadcast %7 : vector<8x1xf32> to vector<8x32xf32>
    %9 = arith.subf %1, %8 : vector<8x32xf32>
    %10 = arith.mulf %9, %9 : vector<8x32xf32>
    %cst_6 = arith.constant dense<0.000000e+00> : vector<8xf32>
    %11 = vector.multi_reduction <add>, %10, %cst_6 [1] : vector<8x32xf32> to vector<8xf32>
    %12 = vector.shape_cast %11 : vector<8xf32> to vector<8x1xf32>
    %cst_7 = arith.constant 3.200000e+01 : f32
    %13 = vector.broadcast %cst_7 : f32 to vector<8x1xf32>
    %14 = arith.divf %12, %13 : vector<8x1xf32>
    %15 = vector.broadcast %7 : vector<8x1xf32> to vector<8x32xf32>
    %16 = arith.subf %1, %15 : vector<8x32xf32>
    %cst_8 = arith.constant 9.99999974E-6 : f32
    %17 = vector.broadcast %cst_8 : f32 to vector<8x1xf32>
    %18 = arith.addf %14, %17 : vector<8x1xf32>
    %19 = math.rsqrt %18 : vector<8x1xf32>
    %20 = vector.broadcast %19 : vector<8x1xf32> to vector<8x32xf32>
    %21 = arith.mulf %16, %20 : vector<8x32xf32>
    %c0_9 = arith.constant 0 : index
    %c0_10 = arith.constant 0 : index
    %22 = vector.load %arg3[%c0_9, %c0_10] : memref<1x32xf32, #tpu.memory_space<vmem>>, vector<1x32xf32>
    %23 = vector.broadcast %22 : vector<1x32xf32> to vector<8x32xf32>
    %24 = arith.mulf %21, %23 : vector<8x32xf32>
    %c0_11 = arith.constant 0 : index
    %c0_12 = arith.constant 0 : index
    %25 = vector.load %arg4[%c0_11, %c0_12] : memref<1x32xf32, #tpu.memory_space<vmem>>, vector<1x32xf32>
    %26 = vector.broadcast %25 : vector<1x32xf32> to vector<8x32xf32>
    %27 = arith.addf %24, %26 : vector<8x32xf32>
    %28 = arith.truncf %27 : vector<8x32xf32> to vector<8x32xbf16>
    %c0_13 = arith.constant 0 : index
    %c0_14 = arith.constant 0 : index
    %29 = vector.load %arg5[%c0_13, %c0_14] : memref<32x96xbf16, #tpu.memory_space<vmem>>, vector<32x96xbf16>
    %cst_15 = arith.constant dense<0.000000e+00> : vector<8x96xf32>
    %30 = tpu.matmul %28, %29, %cst_15 {dimension_numbers = #tpu.dot_dimension_numbers<[1], [0], [0], [1], [0, 0, 1, 1], [], []>} : vector<8x32xbf16>, vector<32x96xbf16>, vector<8x96xf32> -> vector<8x96xf32>
    %c0_16 = arith.constant 0 : index
    %c0_17 = arith.constant 0 : index
    %31 = vector.load %arg6[%c0_16, %c0_17] : memref<1x96xf32, #tpu.memory_space<vmem>>, vector<1x96xf32>
    %32 = vector.broadcast %31 : vector<1x96xf32> to vector<8x96xf32>
    %33 = arith.addf %30, %32 : vector<8x96xf32>
    %34 = vector.extract_strided_slice %33 {offsets = [0, 0], sizes = [8, 8], strides = [1, 1]} : vector<8x96xf32> to vector<8x8xf32>
    %35 = arith.truncf %34 : vector<8x8xf32> to vector<8x8xbf16>
    %36 = vector.extract_strided_slice %33 {offsets = [0, 32], sizes = [8, 8], strides = [1, 1]} : vector<8x96xf32> to vector<8x8xf32>
    %37 = arith.truncf %36 : vector<8x8xf32> to vector<8x8xbf16>
    %38 = vector.extract_strided_slice %33 {offsets = [0, 64], sizes = [8, 8], strides = [1, 1]} : vector<8x96xf32> to vector<8x8xf32>
    %39 = arith.truncf %38 : vector<8x8xf32> to vector<8x8xbf16>
    %cst_18 = arith.constant dense<0.000000e+00> : vector<8x8xf32>
    %40 = tpu.matmul %35, %37, %cst_18 {dimension_numbers = #tpu.dot_dimension_numbers<[1], [1], [0], [0], [0, 0, 1, 0], [], []>} : vector<8x8xbf16>, vector<8x8xbf16>, vector<8x8xf32> -> vector<8x8xf32>
    %41 = vector.broadcast %3 : vector<1x8xf32> to vector<8x8xf32>
    %42 = arith.addf %40, %41 : vector<8x8xf32>
    %cst_19 = arith.constant dense<0xFF800000> : vector<8xf32>
    %43 = vector.multi_reduction <maximumf>, %42, %cst_19 [1] : vector<8x8xf32> to vector<8xf32>
    %44 = vector.shape_cast %43 : vector<8xf32> to vector<8x1xf32>
    %45 = vector.broadcast %44 : vector<8x1xf32> to vector<8x8xf32>
    %46 = arith.subf %42, %45 : vector<8x8xf32>
    %47 = math.exp %46 : vector<8x8xf32>
    %cst_20 = arith.constant dense<0.000000e+00> : vector<8xf32>
    %48 = vector.multi_reduction <add>, %47, %cst_20 [1] : vector<8x8xf32> to vector<8xf32>
    %49 = vector.shape_cast %48 : vector<8xf32> to vector<8x1xf32>
    %50 = arith.truncf %47 : vector<8x8xf32> to vector<8x8xbf16>
    %cst_21 = arith.constant dense<0.000000e+00> : vector<8x8xf32>
    %51 = tpu.matmul %50, %39, %cst_21 {dimension_numbers = #tpu.dot_dimension_numbers<[1], [0], [0], [1], [0, 0, 1, 1], [], []>} : vector<8x8xbf16>, vector<8x8xbf16>, vector<8x8xf32> -> vector<8x8xf32>
    %52 = tpu.reciprocal %49 {approx = true} : vector<8x1xf32> -> vector<8x1xf32>
    %53 = vector.broadcast %52 : vector<8x1xf32> to vector<8x8xf32>
    %54 = arith.mulf %51, %53 : vector<8x8xf32>
    %55 = vector.extract_strided_slice %33 {offsets = [0, 8], sizes = [8, 8], strides = [1, 1]} : vector<8x96xf32> to vector<8x8xf32>
    %56 = arith.truncf %55 : vector<8x8xf32> to vector<8x8xbf16>
    %57 = vector.extract_strided_slice %33 {offsets = [0, 40], sizes = [8, 8], strides = [1, 1]} : vector<8x96xf32> to vector<8x8xf32>
    %58 = arith.truncf %57 : vector<8x8xf32> to vector<8x8xbf16>
    %59 = vector.extract_strided_slice %33 {offsets = [0, 72], sizes = [8, 8], strides = [1, 1]} : vector<8x96xf32> to vector<8x8xf32>
    %60 = arith.truncf %59 : vector<8x8xf32> to vector<8x8xbf16>
    %cst_22 = arith.constant dense<0.000000e+00> : vector<8x8xf32>
    %61 = tpu.matmul %56, %58, %cst_22 {dimension_numbers = #tpu.dot_dimension_numbers<[1], [1], [0], [0], [0, 0, 1, 0], [], []>} : vector<8x8xbf16>, vector<8x8xbf16>, vector<8x8xf32> -> vector<8x8xf32>
    %62 = vector.broadcast %3 : vector<1x8xf32> to vector<8x8xf32>
    %63 = arith.addf %61, %62 : vector<8x8xf32>
    %cst_23 = arith.constant dense<0xFF800000> : vector<8xf32>
    %64 = vector.multi_reduction <maximumf>, %63, %cst_23 [1] : vector<8x8xf32> to vector<8xf32>
    %65 = vector.shape_cast %64 : vector<8xf32> to vector<8x1xf32>
    %66 = vector.broadcast %65 : vector<8x1xf32> to vector<8x8xf32>
    %67 = arith.subf %63, %66 : vector<8x8xf32>
    %68 = math.exp %67 : vector<8x8xf32>
    %cst_24 = arith.constant dense<0.000000e+00> : vector<8xf32>
    %69 = vector.multi_reduction <add>, %68, %cst_24 [1] : vector<8x8xf32> to vector<8xf32>
    %70 = vector.shape_cast %69 : vector<8xf32> to vector<8x1xf32>
    %71 = arith.truncf %68 : vector<8x8xf32> to vector<8x8xbf16>
    %cst_25 = arith.constant dense<0.000000e+00> : vector<8x8xf32>
    %72 = tpu.matmul %71, %60, %cst_25 {dimension_numbers = #tpu.dot_dimension_numbers<[1], [0], [0], [1], [0, 0, 1, 1], [], []>} : vector<8x8xbf16>, vector<8x8xbf16>, vector<8x8xf32> -> vector<8x8xf32>
    %73 = tpu.reciprocal %70 {approx = true} : vector<8x1xf32> -> vector<8x1xf32>
    %74 = vector.broadcast %73 : vector<8x1xf32> to vector<8x8xf32>
    %75 = arith.mulf %72, %74 : vector<8x8xf32>
    %76 = vector.extract_strided_slice %33 {offsets = [0, 16], sizes = [8, 8], strides = [1, 1]} : vector<8x96xf32> to vector<8x8xf32>
    %77 = arith.truncf %76 : vector<8x8xf32> to vector<8x8xbf16>
    %78 = vector.extract_strided_slice %33 {offsets = [0, 48], sizes = [8, 8], strides = [1, 1]} : vector<8x96xf32> to vector<8x8xf32>
    %79 = arith.truncf %78 : vector<8x8xf32> to vector<8x8xbf16>
    %80 = vector.extract_strided_slice %33 {offsets = [0, 80], sizes = [8, 8], strides = [1, 1]} : vector<8x96xf32> to vector<8x8xf32>
    %81 = arith.truncf %80 : vector<8x8xf32> to vector<8x8xbf16>
    %cst_26 = arith.constant dense<0.000000e+00> : vector<8x8xf32>
    %82 = tpu.matmul %77, %79, %cst_26 {dimension_numbers = #tpu.dot_dimension_numbers<[1], [1], [0], [0], [0, 0, 1, 0], [], []>} : vector<8x8xbf16>, vector<8x8xbf16>, vector<8x8xf32> -> vector<8x8xf32>
    %83 = vector.broadcast %3 : vector<1x8xf32> to vector<8x8xf32>
    %84 = arith.addf %82, %83 : vector<8x8xf32>
    %cst_27 = arith.constant dense<0xFF800000> : vector<8xf32>
    %85 = vector.multi_reduction <maximumf>, %84, %cst_27 [1] : vector<8x8xf32> to vector<8xf32>
    %86 = vector.shape_cast %85 : vector<8xf32> to vector<8x1xf32>
    %87 = vector.broadcast %86 : vector<8x1xf32> to vector<8x8xf32>
    %88 = arith.subf %84, %87 : vector<8x8xf32>
    %89 = math.exp %88 : vector<8x8xf32>
    %cst_28 = arith.constant dense<0.000000e+00> : vector<8xf32>
    %90 = vector.multi_reduction <add>, %89, %cst_28 [1] : vector<8x8xf32> to vector<8xf32>
    %91 = vector.shape_cast %90 : vector<8xf32> to vector<8x1xf32>
    %92 = arith.truncf %89 : vector<8x8xf32> to vector<8x8xbf16>
    %cst_29 = arith.constant dense<0.000000e+00> : vector<8x8xf32>
    %93 = tpu.matmul %92, %81, %cst_29 {dimension_numbers = #tpu.dot_dimension_numbers<[1], [0], [0], [1], [0, 0, 1, 1], [], []>} : vector<8x8xbf16>, vector<8x8xbf16>, vector<8x8xf32> -> vector<8x8xf32>
    %94 = tpu.reciprocal %91 {approx = true} : vector<8x1xf32> -> vector<8x1xf32>
    %95 = vector.broadcast %94 : vector<8x1xf32> to vector<8x8xf32>
    %96 = arith.mulf %93, %95 : vector<8x8xf32>
    %97 = vector.extract_strided_slice %33 {offsets = [0, 24], sizes = [8, 8], strides = [1, 1]} : vector<8x96xf32> to vector<8x8xf32>
    %98 = arith.truncf %97 : vector<8x8xf32> to vector<8x8xbf16>
    %99 = vector.extract_strided_slice %33 {offsets = [0, 56], sizes = [8, 8], strides = [1, 1]} : vector<8x96xf32> to vector<8x8xf32>
    %100 = arith.truncf %99 : vector<8x8xf32> to vector<8x8xbf16>
    %101 = vector.extract_strided_slice %33 {offsets = [0, 88], sizes = [8, 8], strides = [1, 1]} : vector<8x96xf32> to vector<8x8xf32>
    %102 = arith.truncf %101 : vector<8x8xf32> to vector<8x8xbf16>
    %cst_30 = arith.constant dense<0.000000e+00> : vector<8x8xf32>
    %103 = tpu.matmul %98, %100, %cst_30 {dimension_numbers = #tpu.dot_dimension_numbers<[1], [1], [0], [0], [0, 0, 1, 0], [], []>} : vector<8x8xbf16>, vector<8x8xbf16>, vector<8x8xf32> -> vector<8x8xf32>
    %104 = vector.broadcast %3 : vector<1x8xf32> to vector<8x8xf32>
    %105 = arith.addf %103, %104 : vector<8x8xf32>
    %cst_31 = arith.constant dense<0xFF800000> : vector<8xf32>
    %106 = vector.multi_reduction <maximumf>, %105, %cst_31 [1] : vector<8x8xf32> to vector<8xf32>
    %107 = vector.shape_cast %106 : vector<8xf32> to vector<8x1xf32>
    %108 = vector.broadcast %107 : vector<8x1xf32> to vector<8x8xf32>
    %109 = arith.subf %105, %108 : vector<8x8xf32>
    %110 = math.exp %109 : vector<8x8xf32>
    %cst_32 = arith.constant dense<0.000000e+00> : vector<8xf32>
    %111 = vector.multi_reduction <add>, %110, %cst_32 [1] : vector<8x8xf32> to vector<8xf32>
    %112 = vector.shape_cast %111 : vector<8xf32> to vector<8x1xf32>
    %113 = arith.truncf %110 : vector<8x8xf32> to vector<8x8xbf16>
    %cst_33 = arith.constant dense<0.000000e+00> : vector<8x8xf32>
    %114 = tpu.matmul %113, %102, %cst_33 {dimension_numbers = #tpu.dot_dimension_numbers<[1], [0], [0], [1], [0, 0, 1, 1], [], []>} : vector<8x8xbf16>, vector<8x8xbf16>, vector<8x8xf32> -> vector<8x8xf32>
    %115 = tpu.reciprocal %112 {approx = true} : vector<8x1xf32> -> vector<8x1xf32>
    %116 = vector.broadcast %115 : vector<8x1xf32> to vector<8x8xf32>
    %117 = arith.mulf %114, %116 : vector<8x8xf32>
    %118 = tpu.concatenate %54, %75, %96, %117 in 1 : vector<8x8xf32>, vector<8x8xf32>, vector<8x8xf32>, vector<8x8xf32> -> vector<8x32xf32>
    %119 = arith.truncf %118 : vector<8x32xf32> to vector<8x32xbf16>
    %c0_34 = arith.constant 0 : index
    %c0_35 = arith.constant 0 : index
    %120 = vector.load %arg7[%c0_34, %c0_35] : memref<32x32xbf16, #tpu.memory_space<vmem>>, vector<32x32xbf16>
    %cst_36 = arith.constant dense<0.000000e+00> : vector<8x32xf32>
    %121 = tpu.matmul %119, %120, %cst_36 {dimension_numbers = #tpu.dot_dimension_numbers<[1], [0], [0], [1], [0, 0, 1, 1], [], []>} : vector<8x32xbf16>, vector<32x32xbf16>, vector<8x32xf32> -> vector<8x32xf32>
    %c0_37 = arith.constant 0 : index
    %c0_38 = arith.constant 0 : index
    %122 = vector.load %arg8[%c0_37, %c0_38] : memref<1x32xf32, #tpu.memory_space<vmem>>, vector<1x32xf32>
    %123 = vector.broadcast %122 : vector<1x32xf32> to vector<8x32xf32>
    %124 = arith.addf %121, %123 : vector<8x32xf32>
    %125 = arith.addf %1, %124 : vector<8x32xf32>
    %cst_39 = arith.constant dense<0.000000e+00> : vector<8xf32>
    %126 = vector.multi_reduction <add>, %125, %cst_39 [1] : vector<8x32xf32> to vector<8xf32>
    %127 = vector.shape_cast %126 : vector<8xf32> to vector<8x1xf32>
    %cst_40 = arith.constant 3.200000e+01 : f32
    %128 = vector.broadcast %cst_40 : f32 to vector<8x1xf32>
    %129 = arith.divf %127, %128 : vector<8x1xf32>
    %130 = vector.broadcast %129 : vector<8x1xf32> to vector<8x32xf32>
    %131 = arith.subf %125, %130 : vector<8x32xf32>
    %132 = arith.mulf %131, %131 : vector<8x32xf32>
    %cst_41 = arith.constant dense<0.000000e+00> : vector<8xf32>
    %133 = vector.multi_reduction <add>, %132, %cst_41 [1] : vector<8x32xf32> to vector<8xf32>
    %134 = vector.shape_cast %133 : vector<8xf32> to vector<8x1xf32>
    %cst_42 = arith.constant 3.200000e+01 : f32
    %135 = vector.broadcast %cst_42 : f32 to vector<8x1xf32>
    %136 = arith.divf %134, %135 : vector<8x1xf32>
    %137 = vector.broadcast %129 : vector<8x1xf32> to vector<8x32xf32>
    %138 = arith.subf %125, %137 : vector<8x32xf32>
    %cst_43 = arith.constant 9.99999974E-6 : f32
    %139 = vector.broadcast %cst_43 : f32 to vector<8x1xf32>
    %140 = arith.addf %136, %139 : vector<8x1xf32>
    %141 = math.rsqrt %140 : vector<8x1xf32>
    %142 = vector.broadcast %141 : vector<8x1xf32> to vector<8x32xf32>
    %143 = arith.mulf %138, %142 : vector<8x32xf32>
    %c0_44 = arith.constant 0 : index
    %c0_45 = arith.constant 0 : index
    %144 = vector.load %arg9[%c0_44, %c0_45] : memref<1x32xf32, #tpu.memory_space<vmem>>, vector<1x32xf32>
    %145 = vector.broadcast %144 : vector<1x32xf32> to vector<8x32xf32>
    %146 = arith.mulf %143, %145 : vector<8x32xf32>
    %c0_46 = arith.constant 0 : index
    %c0_47 = arith.constant 0 : index
    %147 = vector.load %arg10[%c0_46, %c0_47] : memref<1x32xf32, #tpu.memory_space<vmem>>, vector<1x32xf32>
    %148 = vector.broadcast %147 : vector<1x32xf32> to vector<8x32xf32>
    %149 = arith.addf %146, %148 : vector<8x32xf32>
    %150 = arith.truncf %149 : vector<8x32xf32> to vector<8x32xbf16>
    %c0_48 = arith.constant 0 : index
    %c0_49 = arith.constant 0 : index
    %151 = vector.load %arg11[%c0_48, %c0_49] : memref<32x128xbf16, #tpu.memory_space<vmem>>, vector<32x128xbf16>
    %cst_50 = arith.constant dense<0.000000e+00> : vector<8x128xf32>
    %152 = tpu.matmul %150, %151, %cst_50 {dimension_numbers = #tpu.dot_dimension_numbers<[1], [0], [0], [1], [0, 0, 1, 1], [], []>} : vector<8x32xbf16>, vector<32x128xbf16>, vector<8x128xf32> -> vector<8x128xf32>
    %c0_51 = arith.constant 0 : index
    %c0_52 = arith.constant 0 : index
    %153 = vector.load %arg12[%c0_51, %c0_52] : memref<1x128xf32, #tpu.memory_space<vmem>>, vector<1x128xf32>
    %154 = vector.broadcast %153 : vector<1x128xf32> to vector<8x128xf32>
    %155 = arith.addf %152, %154 : vector<8x128xf32>
    %cst_53 = arith.constant 1.702000e+00 : f32
    %156 = vector.broadcast %cst_53 : f32 to vector<8x128xf32>
    %157 = arith.mulf %156, %155 : vector<8x128xf32>
    %158 = arith.negf %157 : vector<8x128xf32>
    %159 = math.exp %158 : vector<8x128xf32>
    %cst_54 = arith.constant 1.000000e+00 : f32
    %160 = vector.broadcast %cst_54 : f32 to vector<8x128xf32>
    %161 = arith.addf %160, %159 : vector<8x128xf32>
    %162 = arith.divf %160, %161 : vector<8x128xf32>
    %163 = arith.mulf %155, %162 : vector<8x128xf32>
    %164 = arith.truncf %163 : vector<8x128xf32> to vector<8x128xbf16>
    %c0_55 = arith.constant 0 : index
    %c0_56 = arith.constant 0 : index
    %165 = vector.load %arg13[%c0_55, %c0_56] : memref<128x32xbf16, #tpu.memory_space<vmem>>, vector<128x32xbf16>
    %cst_57 = arith.constant dense<0.000000e+00> : vector<8x32xf32>
    %166 = tpu.matmul %164, %165, %cst_57 {dimension_numbers = #tpu.dot_dimension_numbers<[1], [0], [0], [1], [0, 0, 1, 1], [], []>} : vector<8x128xbf16>, vector<128x32xbf16>, vector<8x32xf32> -> vector<8x32xf32>
    %c0_58 = arith.constant 0 : index
    %c0_59 = arith.constant 0 : index
    %167 = vector.load %arg14[%c0_58, %c0_59] : memref<1x32xf32, #tpu.memory_space<vmem>>, vector<1x32xf32>
    %168 = vector.broadcast %167 : vector<1x32xf32> to vector<8x32xf32>
    %169 = arith.addf %166, %168 : vector<8x32xf32>
    %170 = arith.addf %125, %169 : vector<8x32xf32>
    %c0_60 = arith.constant 0 : index
    %c0_61 = arith.constant 0 : index
    %c0_62 = arith.constant 0 : index
    %171 = vector.load %arg15[%c0_60, %c0_61, %c0_62] : memref<1x8x32xf32, #tpu.memory_space<vmem>>, vector<1x8x32xf32>
    %172 = vector.shape_cast %171 : vector<1x8x32xf32> to vector<8x32xf32>
    %173 = vector.shape_cast %170 : vector<8x32xf32> to vector<1x8x32xf32>
    tpu.vector_store %arg15[%c0_60, %c0_61, %c0_62], %173 {strides = array<i32>} : memref<1x8x32xf32, #tpu.memory_space<vmem>>, vector<1x8x32xf32>,
    return
  }
  func.func @transform_0(%arg0: i32) -> (i32, i32, i32) {
    %c0_i32 = arith.constant 0 : i32
    %c0_i32_0 = arith.constant 0 : i32
    %c0_i32_1 = arith.constant 0 : i32
    return %arg0, %c0_i32, %c0_i32_0 : i32, i32, i32
  }
  func.func @transform_1(%arg0: i32) -> (i32, i32, i32) {
    %c0_i32 = arith.constant 0 : i32
    %c0_i32_0 = arith.constant 0 : i32
    %c0_i32_1 = arith.constant 0 : i32
    return %arg0, %c0_i32, %c0_i32_0 : i32, i32, i32
  }
  func.func @transform_2(%arg0: i32) -> (i32, i32) {
    %c0_i32 = arith.constant 0 : i32
    %c0_i32_0 = arith.constant 0 : i32
    %c0_i32_1 = arith.constant 0 : i32
    return %c0_i32, %c0_i32_0 : i32, i32
  }
  func.func @transform_3(%arg0: i32) -> (i32, i32) {
    %c0_i32 = arith.constant 0 : i32
    %c0_i32_0 = arith.constant 0 : i32
    %c0_i32_1 = arith.constant 0 : i32
    return %c0_i32, %c0_i32_0 : i32, i32
  }
  func.func @transform_4(%arg0: i32) -> (i32, i32) {
    %c0_i32 = arith.constant 0 : i32
    %c0_i32_0 = arith.constant 0 : i32
    %c0_i32_1 = arith.constant 0 : i32
    return %c0_i32, %c0_i32_0 : i32, i32
  }
  func.func @transform_5(%arg0: i32) -> (i32, i32) {
    %c0_i32 = arith.constant 0 : i32
    %c0_i32_0 = arith.constant 0 : i32
    %c0_i32_1 = arith.constant 0 : i32
    return %c0_i32, %c0_i32_0 : i32, i32
  }
  func.func @transform_6(%arg0: i32) -> (i32, i32) {
    %c0_i32 = arith.constant 0 : i32
    %c0_i32_0 = arith.constant 0 : i32
    %c0_i32_1 = arith.constant 0 : i32
    return %c0_i32, %c0_i32_0 : i32, i32
  }
  func.func @transform_7(%arg0: i32) -> (i32, i32) {
    %c0_i32 = arith.constant 0 : i32
    %c0_i32_0 = arith.constant 0 : i32
    %c0_i32_1 = arith.constant 0 : i32
    return %c0_i32, %c0_i32_0 : i32, i32
  }
  func.func @transform_8(%arg0: i32) -> (i32, i32) {
    %c0_i32 = arith.constant 0 : i32
    %c0_i32_0 = arith.constant 0 : i32
    %c0_i32_1 = arith.constant 0 : i32
    return %c0_i32, %c0_i32_0 : i32, i32
  }
  func.func @transform_9(%arg0: i32) -> (i32, i32) {
    %c0_i32 = arith.constant 0 : i32
    %c0_i32_0 = arith.constant 0 : i32
    %c0_i32_1 = arith.constant 0 : i32
    return %c0_i32, %c0_i32_0 : i32, i32
  }
  func.func @transform_10(%arg0: i32) -> (i32, i32) {
    %c0_i32 = arith.constant 0 : i32
    %c0_i32_0 = arith.constant 0 : i32
    %c0_i32_1 = arith.constant 0 : i32
    return %c0_i32, %c0_i32_0 : i32, i32
  }
  func.func @transform_11(%arg0: i32) -> (i32, i32) {
    %c0_i32 = arith.constant 0 : i32
    %c0_i32_0 = arith.constant 0 : i32
    %c0_i32_1 = arith.constant 0 : i32
    return %c0_i32, %c0_i32_0 : i32, i32
  }
  func.func @transform_12(%arg0: i32) -> (i32, i32) {
    %c0_i32 = arith.constant 0 : i32
    %c0_i32_0 = arith.constant 0 : i32
    %c0_i32_1 = arith.constant 0 : i32
    return %c0_i32, %c0_i32_0 : i32, i32
  }
  func.func @transform_13(%arg0: i32) -> (i32, i32) {
    %c0_i32 = arith.constant 0 : i32
    %c0_i32_0 = arith.constant 0 : i32
    %c0_i32_1 = arith.constant 0 : i32
    return %c0_i32, %c0_i32_0 : i32, i32
  }
  func.func @transform_14(%arg0: i32) -> (i32, i32, i32) {
    %c0_i32 = arith.constant 0 : i32
    %c0_i32_0 = arith.constant 0 : i32
    %c0_i32_1 = arith.constant 0 : i32
    return %arg0, %c0_i32, %c0_i32_0 : i32, i32, i32
  }
}

</mosaic_0001>

<bundles_post_ra>
// kernel: transformer_forward.3
= control target key start
LH: loop header
LB: loop body
LE: loop exit
PB: predicated region body
PF: predicated region fallthrough
CT: control target
= control target key end

     0   :  { %s1722_s29 = smov 0   ;;  %s1919_s0 = inlined_call_operand.vmem [shape: f32[2,8,32], index: 0, kind: input, shape index: {}]   ;;  %s1920_s1 = inlined_call_operand.vmem [shape: f32[2,1,8], index: 1, kind: input, shape index: {}]   ;;  %s1921_s2 = inlined_call_operand.vmem [shape: f32[1,32], index: 2, kind: input, shape index: {}, may-alias: {2,8}]   ;;  %s1922_s3 = inlined_call_operand.vmem [shape: f32[1,32], index: 3, kind: input, shape index: {}, may-alias: {3,9}]   ;;  %s1923_s4 = inlined_call_operand.vmem [shape: bf16[32,96], index: 4, kind: input, shape index: {}]   ;;  %s1924_s5 = inlined_call_operand.vmem [shape: f32[1,96], index: 5, kind: input, shape index: {}]   ;;  %s1925_s6 = inlined_call_operand.vmem [shape: bf16[32,32], index: 6, kind: input, shape index: {}]   ;;  %s1926_s7 = inlined_call_operand.vmem [shape: f32[1,32], index: 7, kind: input, shape index: {}]   ;;  %s1927_s8 = inlined_call_operand.vmem [shape: f32[1,32], index: 8, kind: input, shape index: {}, may-alias: {2,8}]   ;;  %s1928_s9 = inlined_call_operand.vmem [shape: f32[1,32], index: 9, kind: input, shape index: {}, may-alias: {3,9}]   ;;  %s1929_s10 = inlined_call_operand.vmem [shape: bf16[32,128], index: 10, kind: input, shape index: {}]   ;;  %s1930_s11 = inlined_call_operand.vmem [shape: f32[1,128], index: 11, kind: input, shape index: {}]   ;;  %s1931_s12 = inlined_call_operand.vmem [shape: bf16[128,32], index: 12, kind: input, shape index: {}]   ;;  %s1932_s13 = inlined_call_operand.vmem [shape: f32[1,32], index: 13, kind: input, shape index: {}]   ;;  %s1933_s14 = inlined_call_operand.vmem [shape: f32[2,8,32], index: 14, kind: output, shape index: {}]  }
   0x1 LB: > { %s1391_s30 = sadd.s32 4294967295, %s1629_s29   ;;  %p1395_p0 = scmp.ge.s32.totalorder %s1629_s29, 1  ;;  %s1629_s29 = sphi %s1722_s29, %s24_s29  }
   0x2   : > { %p419_p1 = scmp.lt.s32.totalorder %s1629_s29, 3 }
   0x4   : > { %p420_p2 = pnand %p1395_p0, %p419_p1 }
   0x5   : > { %p466_p3 = scmp.lt.s32.totalorder (!%p420_p2), %s1391_s30, 1  ;;  %s1633_s16 = smov (!%p420_p2), 120  }
   0x6   : > { %423 = sbr.rel (%p420_p2) target bundleno = 2312 (0x908), region = 76  ;;  %s1634_s17 = smov (!%p420_p2), 96  }
   0x7   : > { %s1636_s19 = smov (!%p420_p2), 80   ;;  %s1637_s20 = smov (!%p420_p2), 112  }
   0x8   : > { %s1638_s21 = smov (!%p420_p2), 72   ;;  %s1639_s22 = smov (!%p420_p2), 104  }
   0x9   : > { %s1640_s26 = smov (!%p420_p2), 64   ;;  %s1641_s27 = smov (!%p420_p2), 56  }
   0xa   : > { %s1642_s28 = smov (!%p420_p2), 48   ;;  %s1646_s23 = smov (!%p420_p2), 24  }
   0xb   : > { %s1935_s30 = smov (!%p466_p3, %s1391_s30), 1  ;;  %vm480_vm0 = vcmask 261120   ;;  %v1585_v7 = vld [vmem:[%s1923_s4 + $0x8] sm:$0xff]   ;;  %v1631_v8 = vmov 0.0   ;;  %vm1632_vm1 = vmmov 0   ;;  %v1586_v9 = vld [vmem:[%s1923_s4] sm:$0xff]  }
   0xc   : > { %s1396_s15 = sshll.u32 %s1935_s30, 3  ;;  %1469 = vmatprep.subr.bf16.mxu0 %v1631_v8  ;;  %1473 = vmatprep.mubr.msk.bf16.mxu0 %vm1632_vm1, %v1631_v8  ;;  %v1398_v14 = vld [vmem:[%s1921_s2] ss:$0 sm:$0xff]  ;;  %vm588_vm2 = vcmask 64512   ;;  %s472_s25 = scalar_lea.vmem %s1920_s1, %s1935_s30  ;;  %vm650_vm3 = vcmask 1043456   ;;  %vm1039_vm4 = vcmask 130048  }
   0xd   : > { %s469_s18 = scalar_lea.vmem %s1919_s0, %s1396_s15  ;;  %1470 = vmatpush3.bf16.msra.mxu0 %v1585_v7  ;;  %1489 = vmatprep.subr.bf16.mxu1 %v1631_v8  ;;  %v1399_v16 = vld [vmem:[%s1922_s3] ss:$0 sm:$0xff]  ;;  %vm1041_vm5 = vcmask 195584  }
   0xe   : > { %v1738_v0 = vld [vmem:[%s469_s18] sm:$0xff]  ;;  %1471 = vmatprep.subr.bf16.mxu0 %v1631_v8  ;;  %1491 = vmatprep.mubr.msk.bf16.mxu1 %vm1632_vm1, %v1631_v8  ;;  %s1635_s18 = smov 88  }
   0xf   : > { %v481_v1 = vsel %vm480_vm0, %v1738_v0, 0.0  ;;  %v1400_v20 = vld [vmem:[%s1924_s5] ss:$0 sm:$0xff] }
  0x10   : > { %482 = vadd.xlane.f32.xlu0 %v481_v1  ;;  %v1404_v38 = vld [vmem:[%s472_s25] ss:$0 sm:$0xff] }
  0x11   : > { %1472 = vmatpush3.bf16.msra.mxu0 %v1586_v9 }
  0x12   : > { %1477 = vmatprep.subr.bf16.mxu0 %v1631_v8 }
  0x99   : > { %v483_v2 = vpop.xlane.xlu0 %482 }
  0x9a   : > { %v485_v3 = vmul.f32 0.03125, %v483_v2 }
  0x9c   : > { %v486_v4 = vsub.f32 %v1738_v0, %v485_v3 }
  0x9e   : > { %v487_v5 = vmul.f32 %v486_v4, %v486_v4 }
  0xa0   : > { %v488_v6 = vsel %vm480_vm0, %v487_v5, 0.0 }
  0xa1   : > { %489 = vadd.xlane.f32.xlu0 %v488_v6 }
 0x12a   : > { %v490_v10 = vpop.xlane.xlu0 %489 }
 0x12b   : > { %v491_v11 = vmul.f32 0.03125, %v490_v10 }
 0x12d   : > { %v492_v12 = vadd.f32 1e-05, %v491_v11 }
 0x12f   : > { %1599 = vrsqrt.f32 %v492_v12 }
 0x13c   : > { %v1600_v13 = vpop.eup %1599 }
 0x13d   : > { %v494_v15 = vmul.f32 %v1600_v13, %v486_v4 }
 0x13f   : > { %v502_v17 = vmul.f32 %v1398_v14, %v494_v15 }
 0x141   : > { %v510_v18 = vadd.f32 %v1399_v16, %v502_v17 }
 0x143   : > { %v511_v19 = vpack.c.bf16 %v510_v18, %v510_v18 }
 0x145   : > { %1474 = vmatmul.mubr.msk.bf16.vlgmr.msra.gmra.mxu0 %vm480_vm0, %v511_v19 }
 0x146   : > { %1479 = vmatprep.mubr.msk.bf16.mxu0 %vm1632_vm1, %v1631_v8 }
 0x205   : > { %v572_v21 = vpop.f32.mrf.mxu0 }
 0x206   : > { %v573_v22 = vadd.f32 %v1400_v20, %v572_v21 }
 0x207   : > { %v1475_v23 = vpop.f32.mrf.mxu0 }
 0x208   : > { %v1770_v24 = vpack.c.bf16 %v573_v22, %v573_v22 }
 0x209   : > { %v575_v25 = vpop.f32.mrf.mxu0 }
 0x20a   : > { %696 = vrot.lane.b32.xlu0 %v1770_v24, %s1633_s16  ;;  %586 = vrot.lane.b32.xlu1 %v1770_v24, %s1634_s17  ;;  %s1643_s16 = smov 40   ;;  %s1644_s17 = smov 8  }
 0x20b   : > { %v1476_v26 = vpop.f32.mrf.mxu0 }
 0x20e   : > { %698 = vrot.lane.b32.xlu1 %v1770_v24, %s1635_s18 }
 0x212   : > { %808 = vrot.lane.b32.xlu1 %v1770_v24, %s1636_s19 }
 0x216   : > { %806 = vrot.lane.b32.xlu1 %v1770_v24, %s1637_s20 }
 0x21a   : > { %918 = vrot.lane.b32.xlu1 %v1770_v24, %s1638_s21 }
 0x21e   : > { %916 = vrot.lane.b32.xlu1 %v1770_v24, %s1639_s22  ;;  %s1645_s22 = smov 16  }
 0x27c   : > { %v587_v27 = vpop.permute.xlu1 %586  ;;  %v697_v32 = vpop.permute.xlu0 %696 }
 0x27d   : > { %v593_v28 = vsel %vm588_vm2, %v587_v27, 0 }
 0x27e   : > { %1478 = vmatpush3.bf16.xpose.msra.mxu0 %v593_v28 }
 0x27f   : > { %1483 = vmatprep.subr.bf16.mxu0 %v1631_v8 }
 0x280   : > { %v699_v29 = vpop.permute.xlu1 %698 }
 0x281   : > { %v704_v30 = vsel %vm588_vm2, %v699_v29, 0 }
 0x282   : > { %1490 = vmatpush3.bf16.xpose.msra.mxu1 %v704_v30 }
 0x283   : > { %1501 = vmatprep.subr.bf16.mxu1 %v1631_v8 }
 0x284   : > { %v809_v31 = vpop.permute.xlu1 %808 }
 0x285   : > { %1480 = vmatmul.mubr.msk.bf16.vlgmr.msra.gmra.mxu0 %vm588_vm2, %v1770_v24  ;;  %v814_v34 = vsel %vm588_vm2, %v809_v31, 0 }
 0x286   : > { %1485 = vmatprep.mubr.msk.bf16.mxu0 %vm1632_vm1, %v1631_v8 }
 0x288   : > { %v807_v33 = vpop.permute.xlu1 %806 }
 0x289   : > { %1492 = vmatmul.mubr.msk.bf16.vlgmr.msra.gmra.mxu1 %vm588_vm2, %v697_v32 }
 0x28a   : > { %1502 = vmatpush3.bf16.xpose.msra.mxu1 %v814_v34  ;;  %1503 = vmatprep.mubr.msk.bf16.mxu1 %vm1632_vm1, %v1631_v8 }
 0x28b   : > { %1513 = vmatprep.subr.bf16.mxu1 %v1631_v8 }
 0x28c   : > { %v919_v35 = vpop.permute.xlu1 %918 }
 0x28d   : > { %v924_v36 = vsel %vm588_vm2, %v919_v35, 0 }
 0x290   : > { %v917_v37 = vpop.permute.xlu1 %916 }
 0x291   : > { %1504 = vmatmul.mubr.msk.bf16.vlgmr.msra.gmra.mxu1 %vm588_vm2, %v807_v33 }
 0x292   : > { %1514 = vmatpush3.bf16.xpose.msra.mxu1 %v924_v36  ;;  %1515 = vmatprep.mubr.msk.bf16.mxu1 %vm1632_vm1, %v1631_v8 }
 0x293   : > { %1525 = vmatprep.subr.bf16.mxu1 %v1631_v8 }
 0x299   : > { %1516 = vmatmul.mubr.msk.bf16.vlgmr.msra.gmra.mxu1 %vm588_vm2, %v917_v37 }
 0x29a   : > { %1529 = vmatprep.mubr.msk.bf16.mxu1 %vm1632_vm1, %v1631_v8 }
 0x345   : > { %v629_v39 = vpop.f32.mrf.mxu0 }
 0x346   : > { %v630_v40 = vadd.f32 %v1404_v38, %v629_v39 }
 0x347   : > { %v1481_v41 = vpop.f32.mrf.mxu0 }
 0x348   : > { %v635_v42 = vsel %vm588_vm2, %v630_v40, -inf }
 0x349   : > { %v740_v43 = vpop.f32.mrf.mxu1  ;;  %636 = vmax.xlane.f32.xlu1 %v635_v42  ;;  %v632_v44 = vpop.f32.mrf.mxu0 }
 0x34a   : > { %v741_v45 = vadd.f32 %v1404_v38, %v740_v43 }
 0x34b   : > { %v1482_v46 = vpop.f32.mrf.mxu0  ;;  %v1493_v47 = vpop.f32.mrf.mxu1 }
 0x34c   : > { %v746_v48 = vsel %vm588_vm2, %v741_v45, -inf  ;;  %v1588_v47 = vld [vmem:[%s1925_s6] sm:$0xff]  }
 0x34d   : > { %747 = vmax.xlane.f32.xlu0 %v746_v48  ;;  %v743_v49 = vpop.f32.mrf.mxu1 }
 0x34f   : > { %v1494_v50 = vpop.f32.mrf.mxu1 }
 0x351   : > { %v850_v51 = vpop.f32.mrf.mxu1 }
 0x352   : > { %v851_v61 = vadd.f32 %v1404_v38, %v850_v51 }
 0x353   : > { %v1505_v52 = vpop.f32.mrf.mxu1 }
 0x354   : > { %v856_v62 = vsel %vm588_vm2, %v851_v61, -inf }
 0x355   : > { %v853_v53 = vpop.f32.mrf.mxu1 }
 0x357   : > { %v1506_v54 = vpop.f32.mrf.mxu1 }
 0x359   : > { %v960_v55 = vpop.f32.mrf.mxu1 }
 0x35a   : > { %v961_v56 = vadd.f32 %v1404_v38, %v960_v55  ;;  %645 = vrot.lane.b32.xlu1 %v1770_v24, %s1640_s26 }
 0x35b   : > { %v1517_v57 = vpop.f32.mrf.mxu1 }
 0x35c   : > { %v966_v58 = vsel %vm588_vm2, %v961_v56, -inf }
 0x35d   : > { %967 = vmax.xlane.f32.xlu0 %v966_v58  ;;  %v963_v59 = vpop.f32.mrf.mxu1 }
 0x35f   : > { %v1518_v60 = vpop.f32.mrf.mxu1 }
 0x373   : > { %756 = vrot.lane.b32.xlu0 %v1770_v24, %s1641_s27 }
 0x37e   : > { %857 = vmax.xlane.f32.xlu1 %v856_v62 }
 0x38f   : > { %866 = vrot.lane.b32.xlu1 %v1770_v24, %s1642_s28 }
 0x393   : > { %976 = vrot.lane.b32.xlu1 %v1770_v24, %s1643_s16 }
 0x3d2   : > { %v637_v63 = vpop.xlane.xlu1 %636 }
 0x3d3   : > { %v638_v1 = vsub.f32 %v630_v40, %v637_v63 }
 0x3d5   : > { %v639_v2 = vmul.f32 1.442695, %v638_v1 }
 0x3d6   : > { %v748_v3 = vpop.xlane.xlu0 %747  ;;  %v646_v4 = vpop.permute.xlu1 %645 }
 0x3d7   : > { %1601 = vpow2.f32 %v639_v2  ;;  %v749_v5 = vsub.f32 %v741_v45, %v748_v3  ;;  %v652_v6 = vsel %vm650_vm3, %v646_v4, 0  ;;  %v1587_v45 = vld [vmem:[%s1925_s6 + $0x8] sm:$0xff]  }
 0x3d8   : > { %1484 = vmatpush3.bf16.msra.mxu0 %v652_v6  ;;  %1526 = vmatpush3.bf16.msra.mxu1 %v1587_v45 }
 0x3d9   : > { %v750_v7 = vmul.f32 1.442695, %v749_v5  ;;  %1495 = vmatprep.subr.bf16.mxu0 %v1631_v8  ;;  %1527 = vmatprep.subr.bf16.mxu1 %v1631_v8 }
 0x3db   : > { %1603 = vpow2.f32 %v750_v7  ;;  %v1413_v7 = vld [vmem:[%s1926_s7] ss:$0 sm:$0xff] }
 0x3dc   : > { %1528 = vmatpush3.bf16.msra.mxu1 %v1588_v47 }
 0x3dd   : > { %1541 = vmatprep.subr.bf16.mxu1 %v1631_v8 }
 0x3e4   : > { %v1602_v9 = vpop.eup %1601 }
 0x3e5   : > { %v644_v10 = vpack.c.bf16 %v1602_v9, %v1602_v9  ;;  %v641_v21 = vsel %vm588_vm2, %v1602_v9, 0.0 }
 0x3e6   : > { %v968_v11 = vpop.xlane.xlu0 %967 }
 0x3e7   : > { %v969_v12 = vsub.f32 %v961_v56, %v968_v11  ;;  %1486 = vmatmul.mubr.msk.bf16.vlgmr.msra.gmra.mxu0 %vm588_vm2, %v644_v10 }
 0x3e8   : > { %v1604_v13 = vpop.eup %1603  ;;  %1497 = vmatprep.mubr.msk.bf16.mxu0 %vm1632_vm1, %v1631_v8 }
 0x3e9   : > { %v970_v14 = vmul.f32 1.442695, %v969_v12  ;;  %v752_v15 = vsel %vm588_vm2, %v1604_v13, 0.0  ;;  %v755_v18 = vpack.c.bf16 %v1604_v13, %v1604_v13 }
 0x3ea   : > { %753 = vadd.xlane.f32.xlu0 %v752_v15  ;;  %v757_v16 = vpop.permute.xlu0 %756 }
 0x3eb   : > { %1605 = vpow2.f32 %v970_v14  ;;  %v762_v17 = vsel %vm650_vm3, %v757_v16, 0 }
 0x3ec   : > { %1496 = vmatpush3.bf16.msra.mxu0 %v762_v17 }
 0x3ed   : > { %1507 = vmatprep.subr.bf16.mxu0 %v1631_v8 }
 0x3ef   : > { %1498 = vmatmul.mubr.msk.bf16.vlgmr.msra.gmra.mxu0 %vm588_vm2, %v755_v18 }
 0x3f0   : > { %1509 = vmatprep.mubr.msk.bf16.mxu0 %vm1632_vm1, %v1631_v8 }
 0x3f8   : > { %v1606_v19 = vpop.eup %1605 }
 0x3f9   : > { %v972_v20 = vsel %vm588_vm2, %v1606_v19, 0.0  ;;  %v975_v32 = vpack.c.bf16 %v1606_v19, %v1606_v19 }
 0x3fa   : > { %973 = vadd.xlane.f32.xlu0 %v972_v20 }
 0x3fe   : > { %642 = vadd.xlane.f32.xlu0 %v641_v21  ;;  %v1589_v21 = vld [vmem:[%s1929_s10 + $0x8] sm:$0xff]  }
 0x407   : > { %v858_v22 = vpop.xlane.xlu1 %857 }
 0x408   : > { %v859_v23 = vsub.f32 %v851_v61, %v858_v22 }
 0x40a   : > { %v860_v24 = vmul.f32 1.442695, %v859_v23 }
 0x40b   : > { %v867_v25 = vpop.permute.xlu1 %866 }
 0x40c   : > { %1607 = vpow2.f32 %v860_v24  ;;  %v872_v26 = vsel %vm650_vm3, %v867_v25, 0 }
 0x40d   : > { %1508 = vmatpush3.bf16.msra.mxu0 %v872_v26  ;;  %v1417_v26 = vld [vmem:[%s1927_s8] ss:$0 sm:$0xff] }
 0x40e   : > { %1519 = vmatprep.subr.bf16.mxu0 %v1631_v8 }
 0x40f   : > { %v977_v28 = vpop.permute.xlu1 %976 }
 0x410   : > { %v982_v31 = vsel %vm650_vm3, %v977_v28, 0  ;;  %v1418_v28 = vld [vmem:[%s1928_s9] ss:$0 sm:$0xff] }
 0x419   : > { %v1608_v27 = vpop.eup %1607 }
 0x41a   : > { %v862_v29 = vsel %vm588_vm2, %v1608_v27, 0.0  ;;  %v865_v30 = vpack.c.bf16 %v1608_v27, %v1608_v27 }
 0x41b   : > { %863 = vadd.xlane.f32.xlu1 %v862_v29 }
 0x41c   : > { %1510 = vmatmul.mubr.msk.bf16.vlgmr.msra.gmra.mxu0 %vm588_vm2, %v865_v30 }
 0x41d   : > { %1520 = vmatpush3.bf16.msra.mxu0 %v982_v31  ;;  %1521 = vmatprep.mubr.msk.bf16.mxu0 %vm1632_vm1, %v1631_v8 }
 0x41e   : > { %1533 = vmatprep.subr.bf16.mxu0 %v1631_v8 }
 0x424   : > { %1522 = vmatmul.mubr.msk.bf16.vlgmr.msra.gmra.mxu0 %vm588_vm2, %v975_v32  ;;  %v1591_v32 = vld [vmem:[%s1931_s12 + $0x38] sm:$0xff]  }
 0x425   : > { %1537 = vmatprep.mubr.msk.bf16.mxu0 %vm1632_vm1, %v1631_v8  ;;  %1534 = vmatpush3.bf16.msra.mxu0 %v1589_v21 }
 0x426   : > { %1535 = vmatprep.subr.bf16.mxu0 %v1631_v8 }
 0x473   : > { %v754_v33 = vpop.xlane.xlu0 %753 }
 0x474   : > { %1609 = vrcp.f32 %v754_v33  ;;  %v1592_v33 = vld [vmem:[%s1931_s12 + $0x30] sm:$0xff]  }
 0x481   : > { %v1610_v38 = vpop.eup %1609 }
 0x483   : > { %v974_v46 = vpop.xlane.xlu0 %973 }
 0x487   : > { %v643_v60 = vpop.xlane.xlu0 %642 }
 0x4a4   : > { %v864_v44 = vpop.xlane.xlu1 %863 }
 0x4a5   : > { %1611 = vrcp.f32 %v864_v44 }
 0x4a6   : > { %1613 = vrcp.f32 %v974_v46 }
 0x4a7   : > { %v688_v34 = vpop.f32.mrf.mxu0  ;;  %1615 = vrcp.f32 %v643_v60 }
 0x4a9   : > { %v1487_v35 = vpop.f32.mrf.mxu0 }
 0x4aa   : > { %v1594_v35 = vld [vmem:[%s1931_s12 + $0x20] sm:$0xff]  }
 0x4ab   : > { %v691_v36 = vpop.f32.mrf.mxu0 }
 0x4ac   : > { %v1595_v36 = vld [vmem:[%s1931_s12 + $0x18] sm:$0xff]  }
 0x4ad   : > { %v1488_v37 = vpop.f32.mrf.mxu0 }
 0x4ae   : > { %v1596_v37 = vld [vmem:[%s1931_s12 + $0x10] sm:$0xff]  }
 0x4af   : > { %v798_v39 = vpop.f32.mrf.mxu0 }
 0x4b0   : > { %v805_v40 = vmul.f32 %v1610_v38, %v798_v39  ;;  %v1597_v38 = vld [vmem:[%s1931_s12 + $0x8] sm:$0xff]   ;;  %v1598_v39 = vld [vmem:[%s1931_s12] sm:$0xff]  }
 0x4b1   : > { %v1499_v41 = vpop.f32.mrf.mxu0 }
 0x4b2   : > { %1027 = vrot.lane.b32.xlu1 %v805_v40, %s1644_s17  ;;  %v1612_v48 = vpop.eup %1611  ;;  %v1419_v40 = vld [vmem:[%s1930_s11] ss:$0 sm:$0xff]  ;;  %s476_s17 = scalar_lea.vmem %s1933_s14, %s1396_s15 }
 0x4b3   : > { %v801_v42 = vpop.f32.mrf.mxu0  ;;  %v1614_v54 = vpop.eup %1613 }
 0x4b4   : > { %v1616_v61 = vpop.eup %1615 }
 0x4b5   : > { %v1500_v43 = vpop.f32.mrf.mxu0  ;;  %v695_v63 = vmul.f32 %v1616_v61, %v688_v34  ;;  %v1593_v34 = vld [vmem:[%s1931_s12 + $0x28] sm:$0xff]  }
 0x4dc   : > { %v908_v49 = vpop.f32.mrf.mxu0 }
 0x4dd   : > { %v915_v50 = vmul.f32 %v1612_v48, %v908_v49 }
 0x4de   : > { %v1511_v51 = vpop.f32.mrf.mxu0 }
 0x4df   : > { %1031 = vrot.lane.b32.xlu0 %v915_v50, %s1645_s22 }
 0x4e0   : > { %v911_v52 = vpop.f32.mrf.mxu0 }
 0x4e1   : > { %v1424_v52 = vld [vmem:[%s1932_s13] ss:$0 sm:$0xff] }
 0x4e2   : > { %v1512_v53 = vpop.f32.mrf.mxu0 }
 0x4e4   : > { %v1018_v55 = vpop.f32.mrf.mxu0 }
 0x4e5   : > { %v1025_v56 = vmul.f32 %v1614_v54, %v1018_v55 }
 0x4e6   : > { %v1523_v57 = vpop.f32.mrf.mxu0 }
 0x4e7   : > { %1035 = vrot.lane.b32.xlu1 %v1025_v56, %s1646_s23 }
 0x4e8   : > { %v1021_v58 = vpop.f32.mrf.mxu0 }
 0x4ea   : > { %v1524_v59 = vpop.f32.mrf.mxu0 }
 0x524   : > { %v1028_v62 = vpop.permute.xlu1 %1027 }
 0x525   : > { %v1038_v2 = vsel %vm588_vm2, %v695_v63, %v1028_v62 }
 0x551   : > { %v1032_v1 = vpop.permute.xlu0 %1031 }
 0x552   : > { %v1040_v3 = vsel %vm1039_vm4, %v1038_v2, %v1032_v1 }
 0x559   : > { %v1036_v4 = vpop.permute.xlu1 %1035 }
 0x55a   : > { %v1042_v5 = vsel %vm1041_vm5, %v1040_v3, %v1036_v4 }
 0x55b   : > { %v1043_v6 = vpack.c.bf16 %v1042_v5, %v1042_v5 }
 0x55d   : > { %1530 = vmatmul.mubr.msk.bf16.vlgmr.msra.gmra.mxu1 %vm480_vm0, %v1043_v6 }
 0x55e   : > { %1557 = vmatprep.mubr.msk.bf16.mxu1 %vm1632_vm1, %v1631_v8  ;;  %1542 = vmatpush3.bf16.msra.mxu1 %v1591_v32 }
 0x55f   : > { %1543 = vmatprep.subr.bf16.mxu1 %v1631_v8 }
 0x562   : > { %1544 = vmatpush3.bf16.msra.mxu1 %v1592_v33 }
 0x563   : > { %1545 = vmatprep.subr.bf16.mxu1 %v1631_v8 }
 0x566   : > { %1546 = vmatpush3.bf16.msra.mxu1 %v1593_v34 }
 0x567   : > { %1547 = vmatprep.subr.bf16.mxu1 %v1631_v8 }
 0x56a   : > { %1548 = vmatpush3.bf16.msra.mxu1 %v1594_v35 }
 0x56b   : > { %1549 = vmatprep.subr.bf16.mxu1 %v1631_v8 }
 0x56e   : > { %1550 = vmatpush3.bf16.msra.mxu1 %v1595_v36 }
 0x56f   : > { %1551 = vmatprep.subr.bf16.mxu1 %v1631_v8 }
 0x572   : > { %1552 = vmatpush3.bf16.msra.mxu1 %v1596_v37 }
 0x573   : > { %1553 = vmatprep.subr.bf16.mxu1 %v1631_v8 }
 0x576   : > { %1554 = vmatpush3.bf16.msra.mxu1 %v1597_v38 }
 0x577   : > { %1555 = vmatprep.subr.bf16.mxu1 %v1631_v8 }
 0x57a   : > { %1556 = vmatpush3.bf16.msra.mxu1 %v1598_v39 }
 0x61d   : > { %v1104_v9 = vpop.f32.mrf.mxu1 }
 0x61e   : > { %v1105_v10 = vadd.f32 %v1413_v7, %v1104_v9 }
 0x61f   : > { %v1531_v11 = vpop.f32.mrf.mxu1 }
 0x620   : > { %v1852_v12 = vadd.f32 %v1105_v10, %v1738_v0  ;;  %v1590_v0 = vld [vmem:[%s1929_s10] sm:$0xff]  }
 0x621   : > { %v1107_v13 = vpop.f32.mrf.mxu1  ;;  %1536 = vmatpush3.bf16.msra.mxu0 %v1590_v0 }
 0x622   : > { %v1111_v14 = vsel %vm480_vm0, %v1852_v12, 0.0 }
 0x623   : > { %1112 = vadd.xlane.f32.xlu1 %v1111_v14  ;;  %v1532_v15 = vpop.f32.mrf.mxu1 }
 0x6ac   : > { %v1113_v16 = vpop.xlane.xlu1 %1112 }
 0x6ad   : > { %v1114_v17 = vmul.f32 0.03125, %v1113_v16 }
 0x6af   : > { %v1115_v18 = vsub.f32 %v1852_v12, %v1114_v17 }
 0x6b1   : > { %v1116_v19 = vmul.f32 %v1115_v18, %v1115_v18 }
 0x6b3   : > { %v1117_v20 = vsel %vm480_vm0, %v1116_v19, 0.0 }
 0x6b4   : > { %1118 = vadd.xlane.f32.xlu0 %v1117_v20 }
 0x73d   : > { %v1119_v22 = vpop.xlane.xlu0 %1118 }
 0x73e   : > { %v1120_v23 = vmul.f32 0.03125, %v1119_v22 }
 0x740   : > { %v1121_v24 = vadd.f32 1e-05, %v1120_v23 }
 0x742   : > { %1617 = vrsqrt.f32 %v1121_v24 }
 0x74f   : > { %v1618_v25 = vpop.eup %1617 }
 0x750   : > { %v1123_v27 = vmul.f32 %v1618_v25, %v1115_v18 }
 0x752   : > { %v1131_v29 = vmul.f32 %v1417_v26, %v1123_v27 }
 0x754   : > { %v1139_v30 = vadd.f32 %v1418_v28, %v1131_v29 }
 0x756   : > { %v1140_v31 = vpack.c.bf16 %v1139_v30, %v1139_v30 }
 0x758   : > { %1538 = vmatmul.mubr.msk.bf16.vlgmr.msra.gmra.mxu0 %vm480_vm0, %v1140_v31 }
 0x818   : > { %v1201_v41 = vpop.f32.mrf.mxu0 }
 0x819   : > { %v1202_v42 = vadd.f32 %v1419_v40, %v1201_v41 }
 0x81a   : > { %v1539_v43 = vpop.f32.mrf.mxu0 }
 0x81b   : > { %v1423_v44 = vmul.f32 -1.702, %v1202_v42 }
 0x81c   : > { %v1204_v45 = vpop.f32.mrf.mxu0 }
 0x81d   : > { %v1209_v46 = vmul.f32 1.442695, %v1423_v44 }
 0x81e   : > { %v1540_v47 = vpop.f32.mrf.mxu0 }
 0x81f   : > { %1619 = vpow2.f32 %v1209_v46 }
 0x82c   : > { %v1620_v48 = vpop.eup %1619 }
 0x82d   : > { %v1211_v8 = vadd.f32 1.0, %v1620_v48 }
 0x82f   : > { %1621 = vrcp.f32 %v1211_v8 }
 0x83c   : > { %v1622_v49 = vpop.eup %1621 }
 0x83d   : > { %v1214_v50 = vmul.f32 %v1622_v49, %v1202_v42 }
 0x83f   : > { %v1215_v51 = vpack.c.bf16 %v1214_v50, %v1214_v50 }
 0x841   : > { %1558 = vmatmul.mubr.bf16.vlgmr.msra.gmra.mxu1 %v1215_v51 }
 0x901   : > { %v1321_v53 = vpop.f32.mrf.mxu1 }
 0x902   : > { %v1322_v54 = vadd.f32 %v1424_v52, %v1321_v53 }
 0x903   : > { %v1559_v55 = vpop.f32.mrf.mxu1 }
 0x904   : > { %v1327_v56 = vadd.f32 %v1322_v54, %v1852_v12 }
 0x905   : > { %v1324_v57 = vpop.f32.mrf.mxu1 }
 0x906   : > { %1328 = vst.msk [vmem:[%s476_s17] sm:$0xff] %vm480_vm0, %v1327_v56 }
 0x907   : > { %v1560_v58 = vpop.f32.mrf.mxu1 }
 0x908 PF: > { %s24_s29 = sadd.s32 1, %s1629_s29  }
 0x909   : > { %p21_p4 = scmp.ge.s32.totalorder %s24_s29, 4  }
 0x90b   :  { %23 = sbr.rel (!%p21_p4) target bundleno = 1 (0x1), region = 109 }

// kernel: transformer_forward.2
= control target key start
LH: loop header
LB: loop body
LE: loop exit
PB: predicated region body
PF: predicated region fallthrough
CT: control target
= control target key end

     0   :  { %19 = vsyncpa [#allocation3], 0  ;;  %s2166_s0 = inlined_call_operand.vmem [shape: f32[2,8,32], index: 0, kind: input, shape index: {}]   ;;  %s2167_s1 = inlined_call_operand.vmem [shape: f32[2,1,8], index: 1, kind: input, shape index: {}]   ;;  %s2168_s2 = inlined_call_operand.vmem [shape: f32[1,32], index: 2, kind: input, shape index: {}, may-alias: {2,8}]   ;;  %s2169_s3 = inlined_call_operand.vmem [shape: f32[1,32], index: 3, kind: input, shape index: {}, may-alias: {3,9}]   ;;  %s2170_s4 = inlined_call_operand.hbm [shape: bf16[32,96], index: 4, kind: input, shape index: {}]   ;;  %s2171_s5 = inlined_call_operand.vmem [shape: f32[1,96], index: 5, kind: input, shape index: {}]   ;;  %s2172_s6 = inlined_call_operand.hbm [shape: bf16[32,32], index: 6, kind: input, shape index: {}]   ;;  %s2173_s7 = inlined_call_operand.vmem [shape: f32[1,32], index: 7, kind: input, shape index: {}]   ;;  %s2174_s8 = inlined_call_operand.vmem [shape: f32[1,32], index: 8, kind: input, shape index: {}, may-alias: {2,8}]   ;;  %s2175_s9 = inlined_call_operand.vmem [shape: f32[1,32], index: 9, kind: input, shape index: {}, may-alias: {3,9}]   ;;  %s2176_s10 = inlined_call_operand.hbm [shape: bf16[32,128], index: 10, kind: input, shape index: {}]   ;;  %s2177_s11 = inlined_call_operand.vmem [shape: f32[1,128], index: 11, kind: input, shape index: {}]   ;;  %s2178_s12 = inlined_call_operand.vmem [shape: bf16[128,32], index: 12, kind: input, shape index: {}]   ;;  %s2179_s13 = inlined_call_operand.vmem [shape: f32[1,32], index: 13, kind: input, shape index: {}]   ;;  %s2180_s14 = inlined_call_operand.vmem [shape: f32[2,8,32], index: 14, kind: output, shape index: {}]  }
   0x1   :  { %20 = vsyncpa [#allocation5], 0  ;;  %s1927_s29 = smov 0  }
   0x2 LB: > { %s1933_s30 = sadd.s32 4294967295, %s1829_s29   ;;  %p1468_p0 = scmp.ge.s32.totalorder %s1829_s29, 1  ;;  %s1829_s29 = sphi %s1927_s29, %s26_s29  }
   0x3   : > { %p361_p1 = scmp.lt.s32.totalorder %s1829_s29, 3  ;;  %p1664_p2 = scmp.eq.s32.totalorder %s1933_s30, 0 }
   0x4   : > { %s1831_s16 = smov [#allocation4]   ;;  %s1832_s18 = smov [#allocation2]  }
   0x5   : > { %p1938_p3 = pnand %p1468_p0, %p361_p1  ;;  %s395_s17 = sshll.u32 %s1831_s16, 4  ;;  %s396_s17 = int_to_ptr.vmem [resolvable:$true] %s395_s17 }
   0x6   : > { %s379_s19 = sshll.u32 %s1832_s18, 4  ;;  %s1833_s21 = smov [#allocation6]   ;;  %s380_s19 = int_to_ptr.vmem [resolvable:$true] %s379_s19 }
   0x7   : > { %p1654_p4 = pneg %p1938_p3  ;;  %s417_s22 = sshll.u32 %s1833_s21, 4  ;;  %s1950_s22 = int_to_ptr.vmem [resolvable:$true] %s417_s22 }
   0x8   : > { %s1748_s23 = scalar_lea.vmem %s396_s17, 256  ;;  %p1756_p10 = scmp.lt.s32.totalorder %s396_s17, %s396_s17 }
   0x9   : > { %p1946_p5 = pnand %p1664_p2, %p1654_p4  ;;  %p1749_p7 = scmp.ne.s32.totalorder %s396_s17, %s1748_s23 }
   0xa   : > { %p1757_p11 = scmp.lt.s32.totalorder %s1748_s23, %s1748_s23 }
   0xb   : > { %p1739_p6 = pneg %p1946_p5 }
   0xc   : > { %p1758_p12 = por %p1757_p11, %p1756_p10 }
   0xd   : > { %p1751_p8 = pnand %p1749_p7, %p1739_p6 }
   0xf   : > { %p1752_p9 = pneg %p1751_p8 }
  0x11   : > { %p1759_p13 = pnand %p1758_p12, %p1752_p9 }
  0x13   : > { %1762 = shalt.err (!%p1759_p13)
}
  0x14   : > { %s1834_s24 = smov 64   ;;  %s1835_s25 = smov 4  }
  0x15   : > { %1660 = dma.hbm_to_vmem [thread:$0]  (!%p1946_p5), %s2172_s6, 256, %s396_s17, [#allocation5], %s1834_s24, %s1834_s24, %s1835_s25  }
  0x16   : > { %s1774_s28 = scalar_lea.vmem %s380_s19, 256  ;;  %p1782_p7 = scmp.lt.s32.totalorder %s380_s19, %s380_s19 }
  0x17   : > { %p1775_p0 = scmp.ne.s32.totalorder %s380_s19, %s1774_s28  ;;  %p1783_p8 = scmp.lt.s32.totalorder %s1774_s28, %s1774_s28 }
  0x19   : > { %p1777_p1 = pnand %p1775_p0, %p1739_p6  ;;  %p1784_p10 = por %p1783_p8, %p1782_p7 }
  0x1b   : > { %p1778_p4 = pneg %p1777_p1 }
  0x1d   : > { %p1785_p9 = pnand %p1784_p10, %p1778_p4 }
  0x1f   : > { %1788 = shalt.err (!%p1785_p9)
}
  0x20   : > { %1657 = dma.hbm_to_vmem [thread:$0]  (!%p1946_p5), %s2170_s4, 256, %s380_s19, [#allocation3], %s1834_s24, %s1834_s24, %s1835_s25  }
  0x21   : > { %s1800_s17 = scalar_lea.vmem %s1950_s22, 256  ;;  %p1808_p0 = scmp.lt.s32.totalorder %s1950_s22, %s1950_s22 }
  0x22   : > { %p1801_p11 = scmp.ne.s32.totalorder %s1950_s22, %s1800_s17  ;;  %p1809_p1 = scmp.lt.s32.totalorder %s1800_s17, %s1800_s17 }
  0x24   : > { %p1803_p12 = pnand %p1801_p11, %p1739_p6  ;;  %p1810_p4 = por %p1809_p1, %p1808_p0 }
  0x26   : > { %p1804_p13 = pneg %p1803_p12 }
  0x28   : > { %p1811_p7 = pnand %p1810_p4, %p1804_p13 }
  0x2a   : > { %1814 = shalt.err (!%p1811_p7)
}
  0x2b   : > { %1663 = dma.hbm_to_vmem [thread:$0]  (!%p1946_p5), %s2176_s10, 256, %s1950_s22, [#allocation5], %s1834_s24, %s1834_s24, %s1835_s25  }
  0x2c   : > { %455 = sbr.rel (%p1938_p3) target bundleno = 2355 (0x933), region = 76 }
  0x31   : > { %1820 = dma.done.wait (%p1664_p2), [#allocation3], 256  }
  0x32   : > { %1822 = vsyncadd (%p1664_p2), [#allocation3], 4294967040 }
  0x33   : > { %1824 = dma.done.wait (%p1664_p2), [#allocation5], 512  }
  0x34   : > { %1826 = vsyncadd (%p1664_p2), [#allocation5], 4294966784  ;;  %p510_p6 = scmp.lt.s32.totalorder %s1933_s30, 1  ;;  %vm524_vm0 = vcmask 261120   ;;  %v1699_v7 = vld [vmem:[#allocation2 + $0x8] sm:$0xff]   ;;  %v1836_v8 = vmov 0.0  }
  0x35   : > { %1550 = vmatprep.subr.bf16.mxu0 %v1836_v8  ;;  %vm1837_vm1 = vmmov 0   ;;  %v1700_v9 = vld [vmem:[#allocation2] sm:$0xff]   ;;  %1570 = vmatprep.subr.bf16.mxu1 %v1836_v8  ;;  %s1838_s18 = smov 120   ;;  %s1839_s17 = smov 96   ;;  %vm632_vm2 = vcmask 64512   ;;  %vm694_vm3 = vcmask 1043456  }
  0x36   : > { %s2184_s30 = smov (!%p510_p6, %s1933_s30), 1  ;;  %1554 = vmatprep.mubr.msk.bf16.mxu0 %vm1837_vm1, %v1836_v8  ;;  %1551 = vmatpush3.bf16.msra.mxu0 %v1699_v7  ;;  %v1479_v14 = vld [vmem:[%s2168_s2] ss:$0 sm:$0xff]  ;;  %s1840_s21 = smov 88   ;;  %vm1083_vm4 = vcmask 130048   ;;  %vm1085_vm5 = vcmask 195584  }
  0x37   : > { %s1477_s15 = sshll.u32 %s2184_s30, 3  ;;  %1552 = vmatprep.subr.bf16.mxu0 %v1836_v8  ;;  %1572 = vmatprep.mubr.msk.bf16.mxu1 %vm1837_vm1, %v1836_v8  ;;  %v1480_v16 = vld [vmem:[%s2169_s3] ss:$0 sm:$0xff]  ;;  %s1841_s23 = smov 80  }
  0x38   : > { %s513_s22 = scalar_lea.vmem %s2166_s0, %s1477_s15  ;;  %v1481_v20 = vld [vmem:[%s2171_s5] ss:$0 sm:$0xff]  ;;  %s1842_s19 = smov 112  }
  0x39   : > { %v2003_v0 = vld [vmem:[%s513_s22] sm:$0xff]  ;;  %s1843_s20 = smov 72   ;;  %s1844_s22 = smov 104  }
  0x3a   : > { %v525_v1 = vsel %vm524_vm0, %v2003_v0, 0.0  ;;  %1553 = vmatpush3.bf16.msra.mxu0 %v1700_v9  ;;  %s516_s26 = scalar_lea.vmem %s2167_s1, %s2184_s30  ;;  %s1845_s27 = smov 64  }
  0x3b   : > { %526 = vadd.xlane.f32.xlu0 %v525_v1  ;;  %1558 = vmatprep.subr.bf16.mxu0 %v1836_v8  ;;  %v1485_v38 = vld [vmem:[%s516_s26] ss:$0 sm:$0xff]  ;;  %s1846_s28 = smov 56   ;;  %s1847_s16 = smov 48  }
  0xc4   : > { %v527_v2 = vpop.xlane.xlu0 %526 }
  0xc5   : > { %v529_v3 = vmul.f32 0.03125, %v527_v2 }
  0xc7   : > { %v530_v4 = vsub.f32 %v2003_v0, %v529_v3 }
  0xc9   : > { %v531_v5 = vmul.f32 %v530_v4, %v530_v4 }
  0xcb   : > { %v532_v6 = vsel %vm524_vm0, %v531_v5, 0.0 }
  0xcc   : > { %533 = vadd.xlane.f32.xlu0 %v532_v6 }
 0x155   : > { %v534_v10 = vpop.xlane.xlu0 %533 }
 0x156   : > { %v535_v11 = vmul.f32 0.03125, %v534_v10 }
 0x158   : > { %v536_v12 = vadd.f32 1e-05, %v535_v11 }
 0x15a   : > { %1713 = vrsqrt.f32 %v536_v12 }
 0x167   : > { %v1714_v13 = vpop.eup %1713 }
 0x168   : > { %v538_v15 = vmul.f32 %v1714_v13, %v530_v4 }
 0x16a   : > { %v546_v17 = vmul.f32 %v1479_v14, %v538_v15 }
 0x16c   : > { %v554_v18 = vadd.f32 %v1480_v16, %v546_v17 }
 0x16e   : > { %v555_v19 = vpack.c.bf16 %v554_v18, %v554_v18 }
 0x170   : > { %1555 = vmatmul.mubr.msk.bf16.vlgmr.msra.gmra.mxu0 %vm524_vm0, %v555_v19 }
 0x171   : > { %1560 = vmatprep.mubr.msk.bf16.mxu0 %vm1837_vm1, %v1836_v8 }
 0x230   : > { %v616_v21 = vpop.f32.mrf.mxu0 }
 0x231   : > { %v617_v22 = vadd.f32 %v1481_v20, %v616_v21 }
 0x232   : > { %v1556_v23 = vpop.f32.mrf.mxu0 }
 0x233   : > { %v2029_v24 = vpack.c.bf16 %v617_v22, %v617_v22 }
 0x234   : > { %v619_v25 = vpop.f32.mrf.mxu0 }
 0x235   : > { %740 = vrot.lane.b32.xlu0 %v2029_v24, %s1838_s18  ;;  %630 = vrot.lane.b32.xlu1 %v2029_v24, %s1839_s17  ;;  %s1848_s18 = smov 40   ;;  %s1849_s17 = smov 8  }
 0x236   : > { %v1557_v26 = vpop.f32.mrf.mxu0 }
 0x239   : > { %742 = vrot.lane.b32.xlu1 %v2029_v24, %s1840_s21  ;;  %s1850_s21 = smov 16  }
 0x23d   : > { %852 = vrot.lane.b32.xlu1 %v2029_v24, %s1841_s23  ;;  %s1851_s23 = smov 24  }
 0x241   : > { %850 = vrot.lane.b32.xlu1 %v2029_v24, %s1842_s19 }
 0x245   : > { %962 = vrot.lane.b32.xlu1 %v2029_v24, %s1843_s20 }
 0x249   : > { %960 = vrot.lane.b32.xlu1 %v2029_v24, %s1844_s22  ;;  %s520_s22 = scalar_lea.vmem %s2180_s14, %s1477_s15 }
 0x2a7   : > { %v631_v27 = vpop.permute.xlu1 %630  ;;  %v741_v32 = vpop.permute.xlu0 %740 }
 0x2a8   : > { %v637_v28 = vsel %vm632_vm2, %v631_v27, 0 }
 0x2a9   : > { %1559 = vmatpush3.bf16.xpose.msra.mxu0 %v637_v28 }
 0x2aa   : > { %1564 = vmatprep.subr.bf16.mxu0 %v1836_v8 }
 0x2ab   : > { %v743_v29 = vpop.permute.xlu1 %742 }
 0x2ac   : > { %v748_v30 = vsel %vm632_vm2, %v743_v29, 0 }
 0x2ad   : > { %1571 = vmatpush3.bf16.xpose.msra.mxu1 %v748_v30 }
 0x2ae   : > { %1582 = vmatprep.subr.bf16.mxu1 %v1836_v8 }
 0x2af   : > { %v853_v31 = vpop.permute.xlu1 %852 }
 0x2b0   : > { %1561 = vmatmul.mubr.msk.bf16.vlgmr.msra.gmra.mxu0 %vm632_vm2, %v2029_v24  ;;  %v858_v34 = vsel %vm632_vm2, %v853_v31, 0 }
 0x2b1   : > { %1566 = vmatprep.mubr.msk.bf16.mxu0 %vm1837_vm1, %v1836_v8 }
 0x2b3   : > { %v851_v33 = vpop.permute.xlu1 %850 }
 0x2b4   : > { %1573 = vmatmul.mubr.msk.bf16.vlgmr.msra.gmra.mxu1 %vm632_vm2, %v741_v32 }
 0x2b5   : > { %1583 = vmatpush3.bf16.xpose.msra.mxu1 %v858_v34  ;;  %1584 = vmatprep.mubr.msk.bf16.mxu1 %vm1837_vm1, %v1836_v8 }
 0x2b6   : > { %1594 = vmatprep.subr.bf16.mxu1 %v1836_v8 }
 0x2b7   : > { %v963_v35 = vpop.permute.xlu1 %962 }
 0x2b8   : > { %v968_v36 = vsel %vm632_vm2, %v963_v35, 0 }
 0x2bb   : > { %v961_v37 = vpop.permute.xlu1 %960 }
 0x2bc   : > { %1585 = vmatmul.mubr.msk.bf16.vlgmr.msra.gmra.mxu1 %vm632_vm2, %v851_v33 }
 0x2bd   : > { %1595 = vmatpush3.bf16.xpose.msra.mxu1 %v968_v36  ;;  %1596 = vmatprep.mubr.msk.bf16.mxu1 %vm1837_vm1, %v1836_v8 }
 0x2be   : > { %1606 = vmatprep.subr.bf16.mxu1 %v1836_v8 }
 0x2c4   : > { %1597 = vmatmul.mubr.msk.bf16.vlgmr.msra.gmra.mxu1 %vm632_vm2, %v961_v37 }
 0x2c5   : > { %1610 = vmatprep.mubr.msk.bf16.mxu1 %vm1837_vm1, %v1836_v8 }
 0x370   : > { %v673_v39 = vpop.f32.mrf.mxu0 }
 0x371   : > { %v674_v40 = vadd.f32 %v1485_v38, %v673_v39 }
 0x372   : > { %v1562_v41 = vpop.f32.mrf.mxu0 }
 0x373   : > { %v679_v42 = vsel %vm632_vm2, %v674_v40, -inf }
 0x374   : > { %v784_v43 = vpop.f32.mrf.mxu1  ;;  %680 = vmax.xlane.f32.xlu1 %v679_v42  ;;  %v676_v44 = vpop.f32.mrf.mxu0 }
 0x375   : > { %v785_v45 = vadd.f32 %v1485_v38, %v784_v43 }
 0x376   : > { %v1563_v46 = vpop.f32.mrf.mxu0  ;;  %v1574_v47 = vpop.f32.mrf.mxu1 }
 0x377   : > { %v790_v48 = vsel %vm632_vm2, %v785_v45, -inf  ;;  %v1702_v47 = vld [vmem:[#allocation4] sm:$0xff]  }
 0x378   : > { %791 = vmax.xlane.f32.xlu0 %v790_v48  ;;  %v787_v49 = vpop.f32.mrf.mxu1 }
 0x37a   : > { %v1575_v50 = vpop.f32.mrf.mxu1 }
 0x37c   : > { %v894_v51 = vpop.f32.mrf.mxu1 }
 0x37d   : > { %v895_v61 = vadd.f32 %v1485_v38, %v894_v51 }
 0x37e   : > { %v1586_v52 = vpop.f32.mrf.mxu1 }
 0x37f   : > { %v900_v62 = vsel %vm632_vm2, %v895_v61, -inf }
 0x380   : > { %v897_v53 = vpop.f32.mrf.mxu1 }
 0x382   : > { %v1587_v54 = vpop.f32.mrf.mxu1 }
 0x384   : > { %v1004_v55 = vpop.f32.mrf.mxu1 }
 0x385   : > { %v1005_v56 = vadd.f32 %v1485_v38, %v1004_v55  ;;  %689 = vrot.lane.b32.xlu1 %v2029_v24, %s1845_s27 }
 0x386   : > { %v1598_v57 = vpop.f32.mrf.mxu1 }
 0x387   : > { %v1010_v58 = vsel %vm632_vm2, %v1005_v56, -inf }
 0x388   : > { %1011 = vmax.xlane.f32.xlu0 %v1010_v58  ;;  %v1007_v59 = vpop.f32.mrf.mxu1 }
 0x38a   : > { %v1599_v60 = vpop.f32.mrf.mxu1 }
 0x39e   : > { %800 = vrot.lane.b32.xlu0 %v2029_v24, %s1846_s28 }
 0x3a9   : > { %901 = vmax.xlane.f32.xlu1 %v900_v62 }
 0x3ba   : > { %910 = vrot.lane.b32.xlu1 %v2029_v24, %s1847_s16 }
 0x3be   : > { %1020 = vrot.lane.b32.xlu1 %v2029_v24, %s1848_s18 }
 0x3fd   : > { %v681_v63 = vpop.xlane.xlu1 %680 }
 0x3fe   : > { %v682_v1 = vsub.f32 %v674_v40, %v681_v63 }
 0x400   : > { %v683_v2 = vmul.f32 1.442695, %v682_v1 }
 0x401   : > { %v792_v3 = vpop.xlane.xlu0 %791  ;;  %v690_v4 = vpop.permute.xlu1 %689 }
 0x402   : > { %1715 = vpow2.f32 %v683_v2  ;;  %v793_v5 = vsub.f32 %v785_v45, %v792_v3  ;;  %v696_v6 = vsel %vm694_vm3, %v690_v4, 0  ;;  %v1701_v45 = vld [vmem:[#allocation4 + $0x8] sm:$0xff]  }
 0x403   : > { %1565 = vmatpush3.bf16.msra.mxu0 %v696_v6  ;;  %1607 = vmatpush3.bf16.msra.mxu1 %v1701_v45 }
 0x404   : > { %v794_v7 = vmul.f32 1.442695, %v793_v5  ;;  %1576 = vmatprep.subr.bf16.mxu0 %v1836_v8  ;;  %1608 = vmatprep.subr.bf16.mxu1 %v1836_v8 }
 0x406   : > { %1717 = vpow2.f32 %v794_v7  ;;  %v1494_v7 = vld [vmem:[%s2173_s7] ss:$0 sm:$0xff] }
 0x407   : > { %1609 = vmatpush3.bf16.msra.mxu1 %v1702_v47 }
 0x408   : > { %1622 = vmatprep.subr.bf16.mxu1 %v1836_v8 }
 0x40f   : > { %v1716_v9 = vpop.eup %1715 }
 0x410   : > { %v688_v10 = vpack.c.bf16 %v1716_v9, %v1716_v9  ;;  %v685_v21 = vsel %vm632_vm2, %v1716_v9, 0.0 }
 0x411   : > { %v1012_v11 = vpop.xlane.xlu0 %1011 }
 0x412   : > { %v1013_v12 = vsub.f32 %v1005_v56, %v1012_v11  ;;  %1567 = vmatmul.mubr.msk.bf16.vlgmr.msra.gmra.mxu0 %vm632_vm2, %v688_v10 }
 0x413   : > { %v1718_v13 = vpop.eup %1717  ;;  %1578 = vmatprep.mubr.msk.bf16.mxu0 %vm1837_vm1, %v1836_v8 }
 0x414   : > { %v1014_v14 = vmul.f32 1.442695, %v1013_v12  ;;  %v796_v15 = vsel %vm632_vm2, %v1718_v13, 0.0  ;;  %v799_v18 = vpack.c.bf16 %v1718_v13, %v1718_v13 }
 0x415   : > { %797 = vadd.xlane.f32.xlu0 %v796_v15  ;;  %v801_v16 = vpop.permute.xlu0 %800 }
 0x416   : > { %1719 = vpow2.f32 %v1014_v14  ;;  %v806_v17 = vsel %vm694_vm3, %v801_v16, 0 }
 0x417   : > { %1577 = vmatpush3.bf16.msra.mxu0 %v806_v17 }
 0x418   : > { %1588 = vmatprep.subr.bf16.mxu0 %v1836_v8 }
 0x41a   : > { %1579 = vmatmul.mubr.msk.bf16.vlgmr.msra.gmra.mxu0 %vm632_vm2, %v799_v18 }
 0x41b   : > { %1590 = vmatprep.mubr.msk.bf16.mxu0 %vm1837_vm1, %v1836_v8 }
 0x423   : > { %v1720_v19 = vpop.eup %1719 }
 0x424   : > { %v1016_v20 = vsel %vm632_vm2, %v1720_v19, 0.0  ;;  %v1019_v32 = vpack.c.bf16 %v1720_v19, %v1720_v19 }
 0x425   : > { %1017 = vadd.xlane.f32.xlu0 %v1016_v20 }
 0x429   : > { %686 = vadd.xlane.f32.xlu0 %v685_v21  ;;  %v1703_v21 = vld [vmem:[#allocation6 + $0x8] sm:$0xff]  }
 0x432   : > { %v902_v22 = vpop.xlane.xlu1 %901 }
 0x433   : > { %v903_v23 = vsub.f32 %v895_v61, %v902_v22  ;;  %v1704_v22 = vld [vmem:[#allocation6] sm:$0xff]  }
 0x435   : > { %v904_v24 = vmul.f32 1.442695, %v903_v23 }
 0x436   : > { %v911_v25 = vpop.permute.xlu1 %910 }
 0x437   : > { %1721 = vpow2.f32 %v904_v24  ;;  %v916_v26 = vsel %vm694_vm3, %v911_v25, 0 }
 0x438   : > { %1589 = vmatpush3.bf16.msra.mxu0 %v916_v26  ;;  %v1498_v26 = vld [vmem:[%s2174_s8] ss:$0 sm:$0xff] }
 0x439   : > { %1600 = vmatprep.subr.bf16.mxu0 %v1836_v8 }
 0x43a   : > { %v1021_v28 = vpop.permute.xlu1 %1020 }
 0x43b   : > { %v1026_v31 = vsel %vm694_vm3, %v1021_v28, 0  ;;  %v1499_v28 = vld [vmem:[%s2175_s9] ss:$0 sm:$0xff] }
 0x444   : > { %v1722_v27 = vpop.eup %1721 }
 0x445   : > { %v906_v29 = vsel %vm632_vm2, %v1722_v27, 0.0  ;;  %v909_v30 = vpack.c.bf16 %v1722_v27, %v1722_v27 }
 0x446   : > { %907 = vadd.xlane.f32.xlu1 %v906_v29 }
 0x447   : > { %1591 = vmatmul.mubr.msk.bf16.vlgmr.msra.gmra.mxu0 %vm632_vm2, %v909_v30 }
 0x448   : > { %1601 = vmatpush3.bf16.msra.mxu0 %v1026_v31  ;;  %1602 = vmatprep.mubr.msk.bf16.mxu0 %vm1837_vm1, %v1836_v8 }
 0x449   : > { %1614 = vmatprep.subr.bf16.mxu0 %v1836_v8 }
 0x44f   : > { %1603 = vmatmul.mubr.msk.bf16.vlgmr.msra.gmra.mxu0 %vm632_vm2, %v1019_v32  ;;  %v1705_v32 = vld [vmem:[%s2178_s12 + $0x38] sm:$0xff]  }
 0x450   : > { %1618 = vmatprep.mubr.msk.bf16.mxu0 %vm1837_vm1, %v1836_v8  ;;  %1615 = vmatpush3.bf16.msra.mxu0 %v1703_v21 }
 0x451   : > { %1616 = vmatprep.subr.bf16.mxu0 %v1836_v8 }
 0x454   : > { %1617 = vmatpush3.bf16.msra.mxu0 %v1704_v22 }
 0x49e   : > { %v798_v33 = vpop.xlane.xlu0 %797 }
 0x49f   : > { %1723 = vrcp.f32 %v798_v33  ;;  %v1706_v33 = vld [vmem:[%s2178_s12 + $0x30] sm:$0xff]  }
 0x4ac   : > { %v1724_v38 = vpop.eup %1723 }
 0x4ae   : > { %v1018_v46 = vpop.xlane.xlu0 %1017 }
 0x4b2   : > { %v687_v60 = vpop.xlane.xlu0 %686 }
 0x4cf   : > { %v908_v44 = vpop.xlane.xlu1 %907 }
 0x4d0   : > { %1725 = vrcp.f32 %v908_v44 }
 0x4d1   : > { %1727 = vrcp.f32 %v1018_v46 }
 0x4d2   : > { %v732_v34 = vpop.f32.mrf.mxu0  ;;  %1729 = vrcp.f32 %v687_v60 }
 0x4d4   : > { %v1568_v35 = vpop.f32.mrf.mxu0 }
 0x4d5   : > { %v1708_v35 = vld [vmem:[%s2178_s12 + $0x20] sm:$0xff]  }
 0x4d6   : > { %v735_v36 = vpop.f32.mrf.mxu0 }
 0x4d7   : > { %v1709_v36 = vld [vmem:[%s2178_s12 + $0x18] sm:$0xff]  }
 0x4d8   : > { %v1569_v37 = vpop.f32.mrf.mxu0 }
 0x4d9   : > { %v1710_v37 = vld [vmem:[%s2178_s12 + $0x10] sm:$0xff]  }
 0x4da   : > { %v842_v39 = vpop.f32.mrf.mxu0 }
 0x4db   : > { %v849_v40 = vmul.f32 %v1724_v38, %v842_v39  ;;  %v1711_v38 = vld [vmem:[%s2178_s12 + $0x8] sm:$0xff]   ;;  %v1712_v39 = vld [vmem:[%s2178_s12] sm:$0xff]  }
 0x4dc   : > { %v1580_v41 = vpop.f32.mrf.mxu0 }
 0x4dd   : > { %1071 = vrot.lane.b32.xlu1 %v849_v40, %s1849_s17  ;;  %v1726_v48 = vpop.eup %1725  ;;  %v1500_v40 = vld [vmem:[%s2177_s11] ss:$0 sm:$0xff] }
 0x4de   : > { %v845_v42 = vpop.f32.mrf.mxu0  ;;  %v1728_v54 = vpop.eup %1727 }
 0x4df   : > { %v1730_v61 = vpop.eup %1729 }
 0x4e0   : > { %v1581_v43 = vpop.f32.mrf.mxu0  ;;  %v739_v63 = vmul.f32 %v1730_v61, %v732_v34  ;;  %v1707_v34 = vld [vmem:[%s2178_s12 + $0x28] sm:$0xff]  }
 0x507   : > { %v952_v49 = vpop.f32.mrf.mxu0 }
 0x508   : > { %v959_v50 = vmul.f32 %v1726_v48, %v952_v49 }
 0x509   : > { %v1592_v51 = vpop.f32.mrf.mxu0 }
 0x50a   : > { %1075 = vrot.lane.b32.xlu0 %v959_v50, %s1850_s21 }
 0x50b   : > { %v955_v52 = vpop.f32.mrf.mxu0 }
 0x50c   : > { %v1505_v52 = vld [vmem:[%s2179_s13] ss:$0 sm:$0xff] }
 0x50d   : > { %v1593_v53 = vpop.f32.mrf.mxu0 }
 0x50f   : > { %v1062_v55 = vpop.f32.mrf.mxu0 }
 0x510   : > { %v1069_v56 = vmul.f32 %v1728_v54, %v1062_v55 }
 0x511   : > { %v1604_v57 = vpop.f32.mrf.mxu0 }
 0x512   : > { %1079 = vrot.lane.b32.xlu1 %v1069_v56, %s1851_s23 }
 0x513   : > { %v1065_v58 = vpop.f32.mrf.mxu0 }
 0x515   : > { %v1605_v59 = vpop.f32.mrf.mxu0 }
 0x54f   : > { %v1072_v62 = vpop.permute.xlu1 %1071 }
 0x550   : > { %v1082_v2 = vsel %vm632_vm2, %v739_v63, %v1072_v62 }
 0x57c   : > { %v1076_v1 = vpop.permute.xlu0 %1075 }
 0x57d   : > { %v1084_v3 = vsel %vm1083_vm4, %v1082_v2, %v1076_v1 }
 0x584   : > { %v1080_v4 = vpop.permute.xlu1 %1079 }
 0x585   : > { %v1086_v5 = vsel %vm1085_vm5, %v1084_v3, %v1080_v4 }
 0x586   : > { %v1087_v6 = vpack.c.bf16 %v1086_v5, %v1086_v5 }
 0x588   : > { %1611 = vmatmul.mubr.msk.bf16.vlgmr.msra.gmra.mxu1 %vm524_vm0, %v1087_v6 }
 0x589   : > { %1638 = vmatprep.mubr.msk.bf16.mxu1 %vm1837_vm1, %v1836_v8  ;;  %1623 = vmatpush3.bf16.msra.mxu1 %v1705_v32 }
 0x58a   : > { %1624 = vmatprep.subr.bf16.mxu1 %v1836_v8 }
 0x58d   : > { %1625 = vmatpush3.bf16.msra.mxu1 %v1706_v33 }
 0x58e   : > { %1626 = vmatprep.subr.bf16.mxu1 %v1836_v8 }
 0x591   : > { %1627 = vmatpush3.bf16.msra.mxu1 %v1707_v34 }
 0x592   : > { %1628 = vmatprep.subr.bf16.mxu1 %v1836_v8 }
 0x595   : > { %1629 = vmatpush3.bf16.msra.mxu1 %v1708_v35 }
 0x596   : > { %1630 = vmatprep.subr.bf16.mxu1 %v1836_v8 }
 0x599   : > { %1631 = vmatpush3.bf16.msra.mxu1 %v1709_v36 }
 0x59a   : > { %1632 = vmatprep.subr.bf16.mxu1 %v1836_v8 }
 0x59d   : > { %1633 = vmatpush3.bf16.msra.mxu1 %v1710_v37 }
 0x59e   : > { %1634 = vmatprep.subr.bf16.mxu1 %v1836_v8 }
 0x5a1   : > { %1635 = vmatpush3.bf16.msra.mxu1 %v1711_v38 }
 0x5a2   : > { %1636 = vmatprep.subr.bf16.mxu1 %v1836_v8 }
 0x5a5   : > { %1637 = vmatpush3.bf16.msra.mxu1 %v1712_v39 }
 0x648   : > { %v1148_v9 = vpop.f32.mrf.mxu1 }
 0x649   : > { %v1149_v10 = vadd.f32 %v1494_v7, %v1148_v9 }
 0x64a   : > { %v1612_v11 = vpop.f32.mrf.mxu1 }
 0x64b   : > { %v2105_v12 = vadd.f32 %v1149_v10, %v2003_v0 }
 0x64c   : > { %v1151_v13 = vpop.f32.mrf.mxu1 }
 0x64d   : > { %v1155_v14 = vsel %vm524_vm0, %v2105_v12, 0.0 }
 0x64e   : > { %1156 = vadd.xlane.f32.xlu1 %v1155_v14  ;;  %v1613_v15 = vpop.f32.mrf.mxu1 }
 0x6d7   : > { %v1157_v16 = vpop.xlane.xlu1 %1156 }
 0x6d8   : > { %v1158_v17 = vmul.f32 0.03125, %v1157_v16 }
 0x6da   : > { %v1159_v18 = vsub.f32 %v2105_v12, %v1158_v17 }
 0x6dc   : > { %v1160_v19 = vmul.f32 %v1159_v18, %v1159_v18 }
 0x6de   : > { %v1161_v20 = vsel %vm524_vm0, %v1160_v19, 0.0 }
 0x6df   : > { %1162 = vadd.xlane.f32.xlu0 %v1161_v20 }
 0x768   : > { %v1163_v0 = vpop.xlane.xlu0 %1162 }
 0x769   : > { %v1164_v23 = vmul.f32 0.03125, %v1163_v0 }
 0x76b   : > { %v1165_v24 = vadd.f32 1e-05, %v1164_v23 }
 0x76d   : > { %1731 = vrsqrt.f32 %v1165_v24 }
 0x77a   : > { %v1732_v25 = vpop.eup %1731 }
 0x77b   : > { %v1167_v27 = vmul.f32 %v1732_v25, %v1159_v18 }
 0x77d   : > { %v1175_v29 = vmul.f32 %v1498_v26, %v1167_v27 }
 0x77f   : > { %v1183_v30 = vadd.f32 %v1499_v28, %v1175_v29 }
 0x781   : > { %v1184_v31 = vpack.c.bf16 %v1183_v30, %v1183_v30 }
 0x783   : > { %1619 = vmatmul.mubr.msk.bf16.vlgmr.msra.gmra.mxu0 %vm524_vm0, %v1184_v31 }
 0x843   : > { %v1245_v41 = vpop.f32.mrf.mxu0 }
 0x844   : > { %v1246_v42 = vadd.f32 %v1500_v40, %v1245_v41 }
 0x845   : > { %v1620_v43 = vpop.f32.mrf.mxu0 }
 0x846   : > { %v1504_v44 = vmul.f32 -1.702, %v1246_v42 }
 0x847   : > { %v1248_v45 = vpop.f32.mrf.mxu0 }
 0x848   : > { %v1253_v46 = vmul.f32 1.442695, %v1504_v44 }
 0x849   : > { %v1621_v47 = vpop.f32.mrf.mxu0 }
 0x84a   : > { %1733 = vpow2.f32 %v1253_v46 }
 0x857   : > { %v1734_v48 = vpop.eup %1733 }
 0x858   : > { %v1255_v8 = vadd.f32 1.0, %v1734_v48 }
 0x85a   : > { %1735 = vrcp.f32 %v1255_v8 }
 0x867   : > { %v1736_v49 = vpop.eup %1735 }
 0x868   : > { %v1258_v50 = vmul.f32 %v1736_v49, %v1246_v42 }
 0x86a   : > { %v1259_v51 = vpack.c.bf16 %v1258_v50, %v1258_v50 }
 0x86c   : > { %1639 = vmatmul.mubr.bf16.vlgmr.msra.gmra.mxu1 %v1259_v51 }
 0x92c   : > { %v1365_v53 = vpop.f32.mrf.mxu1 }
 0x92d   : > { %v1366_v54 = vadd.f32 %v1505_v52, %v1365_v53 }
 0x92e   : > { %v1640_v55 = vpop.f32.mrf.mxu1 }
 0x92f   : > { %v1371_v56 = vadd.f32 %v1366_v54, %v2105_v12 }
 0x930   : > { %v1368_v57 = vpop.f32.mrf.mxu1 }
 0x931   : > { %1372 = vst.msk [vmem:[%s520_s22] sm:$0xff] %vm524_vm0, %v1371_v56 }
 0x932   : > { %v1641_v58 = vpop.f32.mrf.mxu1 }
 0x933 PF: > { %s26_s29 = sadd.s32 1, %s1829_s29  }
 0x934   : > { %p23_p2 = scmp.ge.s32.totalorder %s26_s29, 4  }
 0x936   :  { %25 = sbr.rel (!%p23_p2) target bundleno = 2 (0x2), region = 122 }
 0x93b   :  { %1392 = vsyncpa [#allocation3], 1 }
 0x93c   :  { %1394 = vsyncpa [#allocation3 + $0x1], 1 }
 0x93d   :  { %1395 = vsyncpa [#allocation5], 1 }

</bundles_post_ra>
